<compile_context>
chip_gen: v6e
topology: v6e:2x2x1
jax: 0.10.0
libtpu: 0.0.40
codegen_flags: <defaults>
</compile_context>

<pallas_src>
import functools

import jax
import jax.numpy as jnp
from jax.experimental import pallas as pl
from jax.experimental.pallas import tpu as pltpu


def _normalize_kernel(p_ref, z_ref, pn_ref, zn_ref):
    """Row-wise L2 normalize (F.normalize(x, dim=1), eps = 1e-12).

    x / max(||x||, eps) == x * rsqrt(max(||x||^2, eps^2)); rsqrt uses the EUP
    slot instead of sqrt + divide on the VPU.
    """
    eps2 = jnp.float32(1e-24)  # (1e-12)^2
    p = p_ref[...]
    z = z_ref[...]
    p_scale = jax.lax.rsqrt(jnp.maximum(jnp.sum(p * p, axis=1, keepdims=True), eps2))
    z_scale = jax.lax.rsqrt(jnp.maximum(jnp.sum(z * z, axis=1, keepdims=True), eps2))
    pn_ref[...] = (p * p_scale).astype(pn_ref.dtype)
    zn_ref[...] = (z * z_scale).astype(zn_ref.dtype)


def _sup_simsiam_tile_kernel(t_row_ref, t_col_ref, p_ref, z_ref,
                             sum_ref, cnt_ref):
    """One (tile x tile) block of p_n @ z_n.T with supervised masking.

    Accumulates per output row (across the column-block axis j):
      sum_ref: sum of selected (same-class, off-diagonal) similarities,
      cnt_ref: number of nonzero selected entries (PyTorch nonzero() semantics).
    """
    i = pl.program_id(0)   # row block  ("parallel")
    j = pl.program_id(1)   # col block  ("arbitrary" reduction axis)

    @pl.when(j == 0)
    def _init():
        sum_ref[...] = jnp.zeros_like(sum_ref)
        cnt_ref[...] = jnp.zeros_like(cnt_ref)

    # p @ z.T, contracting the feature axis of both operands (no in-kernel
    # transpose). Operands are bf16 (or f32); accumulation is always f32.
    dot = jax.lax.dot_general(
        p_ref[...], z_ref[...],
        dimension_numbers=(((1,), (1,)), ((), ())),
        preferred_element_type=jnp.float32,
    )  # (tile, tile) f32

    # (tile, 1) == (1, tile) -> (tile, tile) bool: same-class mask.
    same_class = t_row_ref[...] == t_col_ref[...]

    def _accumulate(keep):
        sel = jnp.where(keep, dot, jnp.float32(0.0))
        sum_ref[...] += jnp.sum(sel, axis=1, keepdims=True)
        cnt_ref[...] += jnp.sum((sel != jnp.float32(0.0)).astype(jnp.float32),
                                axis=1, keepdims=True)

    # The anchor-out (identity) exclusion only touches diagonal tiles
    # (tm == tn, so only when i == j): build the iota masks only there.
    @pl.when(i == j)
    def _diag_tile():
        rows = jax.lax.broadcasted_iota(jnp.int32, dot.shape, 0)
        cols = jax.lax.broadcasted_iota(jnp.int32, dot.shape, 1)
        _accumulate(same_class & (rows != cols))

    @pl.when(i != j)
    def _off_diag_tile():
        _accumulate(same_class)


def _normalize(p32, z32, tile, compute_dtype):
    n_pad, d = p32.shape
    g = n_pad // tile
    spec = pl.BlockSpec((tile, d), lambda i: (i, 0))
    return pl.pallas_call(
        _normalize_kernel,
        grid_spec=pltpu.PrefetchScalarGridSpec(
            num_scalar_prefetch=0,
            grid=(g,),
            in_specs=[spec, spec],
            out_specs=[spec, spec],
        ),
        out_shape=(jax.ShapeDtypeStruct((n_pad, d), compute_dtype),
                   jax.ShapeDtypeStruct((n_pad, d), compute_dtype)),
        compiler_params=pltpu.CompilerParams(dimension_semantics=("parallel",)),
    )(p32, z32)


@functools.partial(jax.jit, static_argnames=("tile", "compute_dtype"))
def sup_simsiam_loss(p, z, targets, *, tile=128, compute_dtype=jnp.bfloat16):
    """Pallas implementation of SupSimSiamLoss.forward.

    p, z: (N, D) float arrays; targets: (N,) int array.
    Returns a scalar float32. NaN if no valid positive (same-class,
    off-diagonal) pair exists, matching PyTorch's mean-of-empty behavior.

    tile: row/col block size (multiple of 128; use 256+ on v6e/v7x for the
          256^2 MXU when N is large).
    compute_dtype: MXU operand dtype for the N x N similarity (bf16 default
          for the fast MXU path; f32 accumulation is always used).
    """
    assert p.ndim == 2 and p.shape == z.shape
    assert tile % 128 == 0, "tile must be a multiple of 128 (lane width)"
    n, d = p.shape

    # Pad the batch to a multiple of `tile`. Padded rows are all-zero, so
    # their similarities are exactly 0 and are dropped by the `!= 0` count —
    # the padded target values are irrelevant.
    n_pad = ((n + tile - 1) // tile) * tile
    pad = n_pad - n

    p32 = p.astype(jnp.float32)
    z32 = jax.lax.stop_gradient(z).astype(jnp.float32)   # z = z.detach()
    t = targets.astype(jnp.int32)
    if pad:
        p32 = jnp.pad(p32, ((0, pad), (0, 0)))
        z32 = jnp.pad(z32, ((0, pad), (0, 0)))
        t = jnp.pad(t, (0, pad), constant_values=-1)

    # Normalize each row exactly once (instead of once per grid step).
    pn, zn = _normalize(p32, z32, tile, compute_dtype)

    t_row = t.reshape(n_pad, 1)
    t_col = t.reshape(1, n_pad)
    g = n_pad // tile

    itemsize = jnp.dtype(compute_dtype).itemsize
    cost = pl.CostEstimate(
        flops=int(2 * n_pad * n_pad * d),
        transcendentals=0,
        bytes_accessed=int((g + 1) * n_pad * d * itemsize + 4 * n_pad * 4),
    )

    sums, cnts = pl.pallas_call(
        _sup_simsiam_tile_kernel,
        grid_spec=pltpu.PrefetchScalarGridSpec(
            num_scalar_prefetch=0,
            grid=(g, g),
            in_specs=[
                pl.BlockSpec((tile, 1), lambda i, j: (i, 0)),   # targets (rows)
                pl.BlockSpec((1, tile), lambda i, j: (0, j)),   # targets (cols)
                pl.BlockSpec((tile, d), lambda i, j: (i, 0)),   # p (normalized)
                pl.BlockSpec((tile, d), lambda i, j: (j, 0)),   # z (normalized)
            ],
            out_specs=[
                pl.BlockSpec((tile, 1), lambda i, j: (i, 0)),   # per-row sums
                pl.BlockSpec((tile, 1), lambda i, j: (i, 0)),   # per-row counts
            ],
        ),
        out_shape=(jax.ShapeDtypeStruct((n_pad, 1), jnp.float32),
                   jax.ShapeDtypeStruct((n_pad, 1), jnp.float32)),
        compiler_params=pltpu.CompilerParams(
            dimension_semantics=("parallel", "arbitrary")),
        cost_estimate=cost,
    )(t_row, t_col, pn, zn)

    total = jnp.sum(sums)
    count = jnp.sum(cnts)
    # Kernel accumulates +p.z^T; the loss uses -(p.z^T)  =>  negate once here.
    return -total / count


def _reference(p, z, targets):
    """Plain-JAX reference mirroring the PyTorch module."""
    pn = p / jnp.maximum(jnp.linalg.norm(p, axis=1, keepdims=True), 1e-12)
    zn = z / jnp.maximum(jnp.linalg.norm(z, axis=1, keepdims=True), 1e-12)
    dot = -jnp.matmul(pn, zn.T, precision=jax.lax.Precision.HIGHEST)
    same = targets[:, None] == targets[None, :]
    not_diag = ~jnp.eye(targets.shape[0], dtype=bool)
    sel = dot * (same & not_diag).astype(dot.dtype)
    nz = sel != 0.0
    return jnp.sum(sel) / jnp.sum(nz.astype(jnp.float32))


if __name__ == "__main__":
    key = jax.random.PRNGKey(0)
    kp, kz, kt = jax.random.split(key, 3)

    # Small shapes; N, D deliberately not multiples of 128 to exercise the
    # padding path and a 2x2 tile grid (diagonal + off-diagonal tiles).
    N, D = 200, 96
    p = jax.random.normal(kp, (N, D), dtype=jnp.float32)
    z = jax.random.normal(kz, (N, D), dtype=jnp.float32)
    targets = jax.random.randint(kt, (N,), 0, 4, dtype=jnp.int32)

    ref = _reference(p, z, targets)

    # f32 MXU operands: tight check against the plain-JAX reference.
    loss_f32 = sup_simsiam_loss(p, z, targets, tile=128,
                                compute_dtype=jnp.float32)
    jax.block_until_ready(loss_f32)
    assert jnp.allclose(loss_f32, ref, atol=1e-4, rtol=1e-3), (loss_f32, ref)

    # Default bf16 MXU operands (fast path on v6e/v7x): looser check.
    loss_bf16 = sup_simsiam_loss(p, z, targets)
    jax.block_until_ready(loss_bf16)
    assert jnp.allclose(loss_bf16, ref, atol=5e-3, rtol=2e-2), (loss_bf16, ref)

    print("KERNEL_OK")
</pallas_src>

<mosaic_0001>
module attributes {stable_mosaic.version = 11 : i64} {
  func.func @_normalize_kernel(%arg0: i32, %arg1: memref<128x96xf32, #tpu.memory_space<vmem>>, %arg2: memref<128x96xf32, #tpu.memory_space<vmem>>, %arg3: memref<128x96xf32, #tpu.memory_space<vmem>>, %arg4: memref<128x96xf32, #tpu.memory_space<vmem>>) attributes {dimension_semantics = [#tpu.dimension_semantics<parallel>], iteration_bounds = array<i64: 2>, scalar_prefetch = 0 : i64, scratch_operands = 0 : i64, tpu.core_type = #tpu.core_type<tc>, window_params = [{transform_indices = @transform_0, window_bounds = array<i64: 128, 96>}, {transform_indices = @transform_1, window_bounds = array<i64: 128, 96>}, {transform_indices = @transform_2, window_bounds = array<i64: 128, 96>}, {transform_indices = @transform_3, window_bounds = array<i64: 128, 96>}]} {
    %c0 = arith.constant 0 : index
    %c0_0 = arith.constant 0 : index
    %0 = vector.load %arg1[%c0, %c0_0] : memref<128x96xf32, #tpu.memory_space<vmem>>, vector<128x96xf32>
    %c0_1 = arith.constant 0 : index
    %c0_2 = arith.constant 0 : index
    %1 = vector.load %arg2[%c0_1, %c0_2] : memref<128x96xf32, #tpu.memory_space<vmem>>, vector<128x96xf32>
    %2 = arith.mulf %0, %0 : vector<128x96xf32>
    %cst = arith.constant dense<0.000000e+00> : vector<128xf32>
    %3 = vector.multi_reduction <add>, %2, %cst [1] : vector<128x96xf32> to vector<128xf32>
    %4 = vector.shape_cast %3 : vector<128xf32> to vector<128x1xf32>
    %cst_3 = arith.constant 1.000000e-24 : f32
    %5 = vector.broadcast %cst_3 : f32 to vector<128x1xf32>
    %6 = arith.maximumf %4, %5 : vector<128x1xf32>
    %7 = math.rsqrt %6 : vector<128x1xf32>
    %8 = arith.mulf %1, %1 : vector<128x96xf32>
    %cst_4 = arith.constant dense<0.000000e+00> : vector<128xf32>
    %9 = vector.multi_reduction <add>, %8, %cst_4 [1] : vector<128x96xf32> to vector<128xf32>
    %10 = vector.shape_cast %9 : vector<128xf32> to vector<128x1xf32>
    %cst_5 = arith.constant 1.000000e-24 : f32
    %11 = vector.broadcast %cst_5 : f32 to vector<128x1xf32>
    %12 = arith.maximumf %10, %11 : vector<128x1xf32>
    %13 = math.rsqrt %12 : vector<128x1xf32>
    %14 = vector.broadcast %7 : vector<128x1xf32> to vector<128x96xf32>
    %15 = arith.mulf %0, %14 : vector<128x96xf32>
    %c0_6 = arith.constant 0 : index
    %c0_7 = arith.constant 0 : index
    %16 = vector.load %arg3[%c0_6, %c0_7] : memref<128x96xf32, #tpu.memory_space<vmem>>, vector<128x96xf32>
    tpu.vector_store %arg3[%c0_6, %c0_7], %15 {strides = array<i32>} : memref<128x96xf32, #tpu.memory_space<vmem>>, vector<128x96xf32>,
    %17 = vector.broadcast %13 : vector<128x1xf32> to vector<128x96xf32>
    %18 = arith.mulf %1, %17 : vector<128x96xf32>
    %c0_8 = arith.constant 0 : index
    %c0_9 = arith.constant 0 : index
    %19 = vector.load %arg4[%c0_8, %c0_9] : memref<128x96xf32, #tpu.memory_space<vmem>>, vector<128x96xf32>
    tpu.vector_store %arg4[%c0_8, %c0_9], %18 {strides = array<i32>} : memref<128x96xf32, #tpu.memory_space<vmem>>, vector<128x96xf32>,
    return
  }
  func.func @transform_0(%arg0: i32) -> (i32, i32) {
    %c0_i32 = arith.constant 0 : i32
    %c0_i32_0 = arith.constant 0 : i32
    return %arg0, %c0_i32 : i32, i32
  }
  func.func @transform_1(%arg0: i32) -> (i32, i32) {
    %c0_i32 = arith.constant 0 : i32
    %c0_i32_0 = arith.constant 0 : i32
    return %arg0, %c0_i32 : i32, i32
  }
  func.func @transform_2(%arg0: i32) -> (i32, i32) {
    %c0_i32 = arith.constant 0 : i32
    %c0_i32_0 = arith.constant 0 : i32
    return %arg0, %c0_i32 : i32, i32
  }
  func.func @transform_3(%arg0: i32) -> (i32, i32) {
    %c0_i32 = arith.constant 0 : i32
    %c0_i32_0 = arith.constant 0 : i32
    return %arg0, %c0_i32 : i32, i32
  }
}

module attributes {stable_mosaic.version = 11 : i64} {
  func.func @_sup_simsiam_tile_kernel(%arg0: i32, %arg1: i32, %arg2: memref<128x1xi32, #tpu.memory_space<vmem>>, %arg3: memref<1x128xi32, #tpu.memory_space<vmem>>, %arg4: memref<128x96xf32, #tpu.memory_space<vmem>>, %arg5: memref<128x96xf32, #tpu.memory_space<vmem>>, %arg6: memref<128x1xf32, #tpu.memory_space<vmem>>, %arg7: memref<128x1xf32, #tpu.memory_space<vmem>>) attributes {dimension_semantics = [#tpu.dimension_semantics<parallel>, #tpu.dimension_semantics<arbitrary>], iteration_bounds = array<i64: 2, 2>, scalar_prefetch = 0 : i64, scratch_operands = 0 : i64, tpu.core_type = #tpu.core_type<tc>, window_params = [{transform_indices = @transform_0, window_bounds = array<i64: 128, 1>}, {transform_indices = @transform_1, window_bounds = array<i64: 1, 128>}, {transform_indices = @transform_2, window_bounds = array<i64: 128, 96>}, {transform_indices = @transform_3, window_bounds = array<i64: 128, 96>}, {transform_indices = @transform_4, window_bounds = array<i64: 128, 1>}, {transform_indices = @transform_5, window_bounds = array<i64: 128, 1>}]} {
    %c0_i32 = arith.constant 0 : i32
    %0 = arith.cmpi eq, %arg1, %c0_i32 : i32
    %1 = arith.extui %0 : i1 to i32
    %c0_i32_0 = arith.constant 0 : i32
    %2 = arith.cmpi ne, %1, %c0_i32_0 : i32
    scf.if %2 {
      %cst_10 = arith.constant 0.000000e+00 : f32
      %17 = vector.broadcast %cst_10 : f32 to vector<128x1xf32>
      %c0_11 = arith.constant 0 : index
      %c0_12 = arith.constant 0 : index
      %18 = vector.load %arg6[%c0_11, %c0_12] : memref<128x1xf32, #tpu.memory_space<vmem>>, vector<128x1xf32>
      tpu.vector_store %arg6[%c0_11, %c0_12], %17 {strides = array<i32>} : memref<128x1xf32, #tpu.memory_space<vmem>>, vector<128x1xf32>,
      %cst_13 = arith.constant 0.000000e+00 : f32
      %19 = vector.broadcast %cst_13 : f32 to vector<128x1xf32>
      %c0_14 = arith.constant 0 : index
      %c0_15 = arith.constant 0 : index
      %20 = vector.load %arg7[%c0_14, %c0_15] : memref<128x1xf32, #tpu.memory_space<vmem>>, vector<128x1xf32>
      tpu.vector_store %arg7[%c0_14, %c0_15], %19 {strides = array<i32>} : memref<128x1xf32, #tpu.memory_space<vmem>>, vector<128x1xf32>,
    } else {
    }
    %c0 = arith.constant 0 : index
    %c0_1 = arith.constant 0 : index
    %3 = vector.load %arg4[%c0, %c0_1] : memref<128x96xf32, #tpu.memory_space<vmem>>, vector<128x96xf32>
    %c0_2 = arith.constant 0 : index
    %c0_3 = arith.constant 0 : index
    %4 = vector.load %arg5[%c0_2, %c0_3] : memref<128x96xf32, #tpu.memory_space<vmem>>, vector<128x96xf32>
    %cst = arith.constant dense<0.000000e+00> : vector<128x128xf32>
    %5 = tpu.matmul %3, %4, %cst {dimension_numbers = #tpu.dot_dimension_numbers<[1], [1], [0], [0], [0, 0, 1, 0], [], []>} : vector<128x96xf32>, vector<128x96xf32>, vector<128x128xf32> -> vector<128x128xf32>
    %c0_4 = arith.constant 0 : index
    %c0_5 = arith.constant 0 : index
    %6 = vector.load %arg2[%c0_4, %c0_5] : memref<128x1xi32, #tpu.memory_space<vmem>>, vector<128x1xi32>
    %c0_6 = arith.constant 0 : index
    %c0_7 = arith.constant 0 : index
    %7 = vector.load %arg3[%c0_6, %c0_7] : memref<1x128xi32, #tpu.memory_space<vmem>>, vector<1x128xi32>
    %8 = vector.broadcast %6 : vector<128x1xi32> to vector<128x128xi32>
    %9 = vector.broadcast %7 : vector<1x128xi32> to vector<128x128xi32>
    %10 = arith.cmpi eq, %8, %9 : vector<128x128xi32>
    %11 = arith.cmpi eq, %arg0, %arg1 : i32
    %12 = arith.extui %11 : i1 to i32
    %c0_i32_8 = arith.constant 0 : i32
    %13 = arith.cmpi ne, %12, %c0_i32_8 : i32
    scf.if %13 {
      %17 = tpu.iota {dimensions = array<i32: 0>} : vector<128x128xi32>
      %18 = tpu.iota {dimensions = array<i32: 1>} : vector<128x128xi32>
      %19 = arith.cmpi ne, %17, %18 : vector<128x128xi32>
      %20 = arith.andi %10, %19 : vector<128x128xi1>
      %cst_10 = arith.constant 0.000000e+00 : f32
      %21 = vector.broadcast %cst_10 : f32 to vector<128x128xf32>
      %22 = arith.select %20, %5, %21 : vector<128x128xi1>, vector<128x128xf32>
      %c0_11 = arith.constant 0 : index
      %c0_12 = arith.constant 0 : index
      %23 = vector.load %arg6[%c0_11, %c0_12] : memref<128x1xf32, #tpu.memory_space<vmem>>, vector<128x1xf32>
      %cst_13 = arith.constant dense<0.000000e+00> : vector<128xf32>
      %24 = vector.multi_reduction <add>, %22, %cst_13 [1] : vector<128x128xf32> to vector<128xf32>
      %25 = vector.shape_cast %24 : vector<128xf32> to vector<128x1xf32>
      %26 = arith.addf %23, %25 : vector<128x1xf32>
      %c0_14 = arith.constant 0 : index
      %c0_15 = arith.constant 0 : index
      %27 = vector.load %arg6[%c0_14, %c0_15] : memref<128x1xf32, #tpu.memory_space<vmem>>, vector<128x1xf32>
      tpu.vector_store %arg6[%c0_14, %c0_15], %26 {strides = array<i32>} : memref<128x1xf32, #tpu.memory_space<vmem>>, vector<128x1xf32>,
      %c0_16 = arith.constant 0 : index
      %c0_17 = arith.constant 0 : index
      %28 = vector.load %arg7[%c0_16, %c0_17] : memref<128x1xf32, #tpu.memory_space<vmem>>, vector<128x1xf32>
      %cst_18 = arith.constant 0.000000e+00 : f32
      %29 = vector.broadcast %cst_18 : f32 to vector<128x128xf32>
      %30 = arith.cmpf one, %22, %29 : vector<128x128xf32>
      %31 = arith.extui %30 : vector<128x128xi1> to vector<128x128xi32>
      %32 = arith.sitofp %31 : vector<128x128xi32> to vector<128x128xf32>
      %cst_19 = arith.constant dense<0.000000e+00> : vector<128xf32>
      %33 = vector.multi_reduction <add>, %32, %cst_19 [1] : vector<128x128xf32> to vector<128xf32>
      %34 = vector.shape_cast %33 : vector<128xf32> to vector<128x1xf32>
      %35 = arith.addf %28, %34 : vector<128x1xf32>
      %c0_20 = arith.constant 0 : index
      %c0_21 = arith.constant 0 : index
      %36 = vector.load %arg7[%c0_20, %c0_21] : memref<128x1xf32, #tpu.memory_space<vmem>>, vector<128x1xf32>
      tpu.vector_store %arg7[%c0_20, %c0_21], %35 {strides = array<i32>} : memref<128x1xf32, #tpu.memory_space<vmem>>, vector<128x1xf32>,
    } else {
    }
    %14 = arith.cmpi ne, %arg0, %arg1 : i32
    %15 = arith.extui %14 : i1 to i32
    %c0_i32_9 = arith.constant 0 : i32
    %16 = arith.cmpi ne, %15, %c0_i32_9 : i32
    scf.if %16 {
      %cst_10 = arith.constant 0.000000e+00 : f32
      %17 = vector.broadcast %cst_10 : f32 to vector<128x128xf32>
      %18 = arith.select %10, %5, %17 : vector<128x128xi1>, vector<128x128xf32>
      %c0_11 = arith.constant 0 : index
      %c0_12 = arith.constant 0 : index
      %19 = vector.load %arg6[%c0_11, %c0_12] : memref<128x1xf32, #tpu.memory_space<vmem>>, vector<128x1xf32>
      %cst_13 = arith.constant dense<0.000000e+00> : vector<128xf32>
      %20 = vector.multi_reduction <add>, %18, %cst_13 [1] : vector<128x128xf32> to vector<128xf32>
      %21 = vector.shape_cast %20 : vector<128xf32> to vector<128x1xf32>
      %22 = arith.addf %19, %21 : vector<128x1xf32>
      %c0_14 = arith.constant 0 : index
      %c0_15 = arith.constant 0 : index
      %23 = vector.load %arg6[%c0_14, %c0_15] : memref<128x1xf32, #tpu.memory_space<vmem>>, vector<128x1xf32>
      tpu.vector_store %arg6[%c0_14, %c0_15], %22 {strides = array<i32>} : memref<128x1xf32, #tpu.memory_space<vmem>>, vector<128x1xf32>,
      %c0_16 = arith.constant 0 : index
      %c0_17 = arith.constant 0 : index
      %24 = vector.load %arg7[%c0_16, %c0_17] : memref<128x1xf32, #tpu.memory_space<vmem>>, vector<128x1xf32>
      %cst_18 = arith.constant 0.000000e+00 : f32
      %25 = vector.broadcast %cst_18 : f32 to vector<128x128xf32>
      %26 = arith.cmpf one, %18, %25 : vector<128x128xf32>
      %27 = arith.extui %26 : vector<128x128xi1> to vector<128x128xi32>
      %28 = arith.sitofp %27 : vector<128x128xi32> to vector<128x128xf32>
      %cst_19 = arith.constant dense<0.000000e+00> : vector<128xf32>
      %29 = vector.multi_reduction <add>, %28, %cst_19 [1] : vector<128x128xf32> to vector<128xf32>
      %30 = vector.shape_cast %29 : vector<128xf32> to vector<128x1xf32>
      %31 = arith.addf %24, %30 : vector<128x1xf32>
      %c0_20 = arith.constant 0 : index
      %c0_21 = arith.constant 0 : index
      %32 = vector.load %arg7[%c0_20, %c0_21] : memref<128x1xf32, #tpu.memory_space<vmem>>, vector<128x1xf32>
      tpu.vector_store %arg7[%c0_20, %c0_21], %31 {strides = array<i32>} : memref<128x1xf32, #tpu.memory_space<vmem>>, vector<128x1xf32>,
    } else {
    }
    return
  }
  func.func @transform_0(%arg0: i32, %arg1: i32) -> (i32, i32) {
    %c0_i32 = arith.constant 0 : i32
    %c0_i32_0 = arith.constant 0 : i32
    return %arg0, %c0_i32 : i32, i32
  }
  func.func @transform_1(%arg0: i32, %arg1: i32) -> (i32, i32) {
    %c0_i32 = arith.constant 0 : i32
    %c0_i32_0 = arith.constant 0 : i32
    return %c0_i32, %arg1 : i32, i32
  }
  func.func @transform_2(%arg0: i32, %arg1: i32) -> (i32, i32) {
    %c0_i32 = arith.constant 0 : i32
    %c0_i32_0 = arith.constant 0 : i32
    return %arg0, %c0_i32 : i32, i32
  }
  func.func @transform_3(%arg0: i32, %arg1: i32) -> (i32, i32) {
    %c0_i32 = arith.constant 0 : i32
    %c0_i32_0 = arith.constant 0 : i32
    return %arg1, %c0_i32 : i32, i32
  }
  func.func @transform_4(%arg0: i32, %arg1: i32) -> (i32, i32) {
    %c0_i32 = arith.constant 0 : i32
    %c0_i32_0 = arith.constant 0 : i32
    return %arg0, %c0_i32 : i32, i32
  }
  func.func @transform_5(%arg0: i32, %arg1: i32) -> (i32, i32) {
    %c0_i32 = arith.constant 0 : i32
    %c0_i32_0 = arith.constant 0 : i32
    return %arg0, %c0_i32 : i32, i32
  }
}

</mosaic_0001>

<bundles_post_ra>
// kernel: sup_simsiam_loss.2
= control target key start
LH: loop header
LB: loop body
LE: loop exit
PB: predicated region body
PF: predicated region fallthrough
CT: control target
= control target key end

     0   :  { %s716_s12 = smov 0   ;;  %s1041_s0 = inlined_call_operand.vmem [shape: f32[256,96], index: 0, kind: input, shape index: {}]   ;;  %s1042_s1 = inlined_call_operand.vmem [shape: f32[256,96], index: 1, kind: input, shape index: {}]   ;;  %s1043_s2 = inlined_call_operand.vmem [shape: f32[256,96], index: 2, kind: output, shape index: {0}]   ;;  %s1044_s3 = inlined_call_operand.vmem [shape: f32[256,96], index: 3, kind: output, shape index: {1}]  }
   0x1 LB: > { %s601_s13 = sadd.s32 4294967295, %s694_s12   ;;  %p605_p0 = scmp.ge.s32.totalorder %s694_s12, 1  ;;  %s694_s12 = sphi %s716_s12, %s14_s12  }
   0x2   : > { %p152_p1 = scmp.lt.s32.totalorder %s694_s12, 3 }
   0x4   : > { %p153_p2 = pnand %p605_p0, %p152_p1 }
   0x5   : > { %s606_s14 = sshll.u32 (!%p153_p2), %s601_s13, 4 }
   0x6   : > { %156 = sbr.rel (%p153_p2) target bundleno = 236 (0xec), region = 28  ;;  %p187_p3 = scmp.lt.s32.totalorder (!%p153_p2), %s606_s14, 31 }
   0xb   : > { %s1046_s14 = smov (!%p187_p3, %s606_s14), 31  ;;  %vm258_vm0 = vcmask 785408  }
   0xc   : > { %s724_s15 = sshll.u32 %s1046_s14, 3 }
   0xd   : > { %s730_s18 = scalar_lea.vmem %s1041_s0, %s724_s15  ;;  %s824_s21 = scalar_lea.vmem %s1042_s1, %s724_s15 }
   0xe   : > { %v733_v0 = vld [vmem:[%s730_s18 + $0x10] sm:$0xff]  ;;  %v736_v1 = vld [vmem:[%s730_s18] sm:$0xff]  ;;  %v739_v2 = vld [vmem:[%s730_s18 + $0x18] sm:$0xff]  ;;  %s934_s24 = scalar_lea.vmem %s1043_s2, %s724_s15  ;;  %s986_s27 = scalar_lea.vmem %s1044_s3, %s724_s15 }
   0xf   : > { %v244_v3 = vmul.f32 %v733_v0, %v733_v0  ;;  %v242_v4 = vmul.f32 %v736_v1, %v736_v1  ;;  %v245_v5 = vmul.f32 %v739_v2, %v739_v2  ;;  %v748_v6 = vld [vmem:[%s730_s18 + $0x8] sm:$0xff]  ;;  %v756_v9 = vld [vmem:[%s730_s18 + $0x20] sm:$0xff]  ;;  %v767_v16 = vld [vmem:[%s730_s18 + $0x38] sm:$0xff] }
  0x10   : > { %v243_v7 = vmul.f32 %v748_v6, %v748_v6  ;;  %v753_v8 = vld [vmem:[%s730_s18 + $0x28] sm:$0xff]  ;;  %v246_v15 = vmul.f32 %v756_v9, %v756_v9  ;;  %v770_v17 = vld [vmem:[%s730_s18 + $0x30] sm:$0xff]  ;;  %v249_v20 = vmul.f32 %v767_v16, %v767_v16  ;;  %v782_v23 = vld [vmem:[%s730_s18 + $0x40] sm:$0xff] }
  0x11   : > { %v265_v10 = vsel %vm258_vm0, %v244_v3, 0.0  ;;  %v259_v11 = vsel %vm258_vm0, %v242_v4, 0.0  ;;  %v268_v12 = vsel %vm258_vm0, %v245_v5, 0.0  ;;  %v247_v14 = vmul.f32 %v753_v8, %v753_v8  ;;  %v779_v22 = vld [vmem:[%s730_s18 + $0x48] sm:$0xff]  ;;  %v791_v28 = vld [vmem:[%s730_s18 + $0x58] sm:$0xff]  ;;  %v794_v29 = vld [vmem:[%s730_s18 + $0x50] sm:$0xff] }
  0x12   : > { %266 = vadd.xlane.f32.xlu1 %v265_v10  ;;  %260 = vadd.xlane.f32.xlu0 %v259_v11  ;;  %v262_v13 = vsel %vm258_vm0, %v243_v7, 0.0  ;;  %v271_v19 = vsel %vm258_vm0, %v246_v15, 0.0  ;;  %v248_v21 = vmul.f32 %v770_v17, %v770_v17  ;;  %v280_v24 = vsel %vm258_vm0, %v249_v20, 0.0  ;;  %v803_v34 = vld [vmem:[%s730_s18 + $0x68] sm:$0xff]  ;;  %v806_v35 = vld [vmem:[%s730_s18 + $0x60] sm:$0xff]  ;;  %v815_v40 = vld [vmem:[%s730_s18 + $0x78] sm:$0xff] }
  0x13   : > { %v274_v18 = vsel %vm258_vm0, %v247_v14, 0.0  ;;  %v251_v26 = vmul.f32 %v779_v22, %v779_v22  ;;  %v250_v27 = vmul.f32 %v782_v23, %v782_v23  ;;  %v253_v32 = vmul.f32 %v791_v28, %v791_v28  ;;  %v818_v41 = vld [vmem:[%s730_s18 + $0x70] sm:$0xff]  ;;  %v833_v46 = vld [vmem:[%s824_s21 + $0x8] sm:$0xff]  ;;  %v836_v47 = vld [vmem:[%s824_s21] sm:$0xff] }
  0x14   : > { %v277_v25 = vsel %vm258_vm0, %v248_v21, 0.0  ;;  %v252_v33 = vmul.f32 %v794_v29, %v794_v29  ;;  %v255_v38 = vmul.f32 %v803_v34, %v803_v34  ;;  %v254_v39 = vmul.f32 %v806_v35, %v806_v35  ;;  %v845_v52 = vld [vmem:[%s824_s21 + $0x18] sm:$0xff]  ;;  %v848_v53 = vld [vmem:[%s824_s21 + $0x10] sm:$0xff]  ;;  %v857_v58 = vld [vmem:[%s824_s21 + $0x28] sm:$0xff] }
  0x15   : > { %v286_v30 = vsel %vm258_vm0, %v251_v26, 0.0  ;;  %v283_v31 = vsel %vm258_vm0, %v250_v27, 0.0  ;;  %v292_v36 = vsel %vm258_vm0, %v253_v32, 0.0  ;;  %v257_v44 = vmul.f32 %v815_v40, %v815_v40  ;;  %v860_v59 = vld [vmem:[%s824_s21 + $0x20] sm:$0xff]  ;;  %v869_v3 = vld [vmem:[%s824_s21 + $0x38] sm:$0xff]  ;;  %v872_v4 = vld [vmem:[%s824_s21 + $0x30] sm:$0xff] }
  0x16   : > { %269 = vadd.xlane.f32.xlu1 %v268_v12  ;;  %263 = vadd.xlane.f32.xlu0 %v262_v13  ;;  %v289_v37 = vsel %vm258_vm0, %v252_v33, 0.0  ;;  %v298_v42 = vsel %vm258_vm0, %v255_v38, 0.0  ;;  %v295_v43 = vsel %vm258_vm0, %v254_v39, 0.0  ;;  %v256_v45 = vmul.f32 %v818_v41, %v818_v41  ;;  %v881_v12 = vld [vmem:[%s824_s21 + $0x48] sm:$0xff]  ;;  %v884_v13 = vld [vmem:[%s824_s21 + $0x40] sm:$0xff]  ;;  %v893_v20 = vld [vmem:[%s824_s21 + $0x58] sm:$0xff] }
  0x17   : > { %v304_v48 = vsel %vm258_vm0, %v257_v44, 0.0  ;;  %v340_v50 = vmul.f32 %v833_v46, %v833_v46  ;;  %v339_v51 = vmul.f32 %v836_v47, %v836_v47  ;;  %v342_v56 = vmul.f32 %v845_v52, %v845_v52  ;;  %v896_v21 = vld [vmem:[%s824_s21 + $0x50] sm:$0xff]  ;;  %v917_v38 = vld [vmem:[%s824_s21 + $0x78] sm:$0xff] }
  0x18   : > { %v301_v49 = vsel %vm258_vm0, %v256_v45, 0.0  ;;  %v341_v57 = vmul.f32 %v848_v53, %v848_v53  ;;  %v344_v62 = vmul.f32 %v857_v58, %v857_v58  ;;  %v343_v63 = vmul.f32 %v860_v59, %v860_v59  ;;  %v920_v39 = vld [vmem:[%s824_s21 + $0x70] sm:$0xff] }
  0x19   : > { %v358_v54 = vsel %vm258_vm0, %v340_v50, 0.0  ;;  %v355_v55 = vsel %vm258_vm0, %v339_v51, 0.0  ;;  %v364_v60 = vsel %vm258_vm0, %v342_v56, 0.0  ;;  %v346_v10 = vmul.f32 %v869_v3, %v869_v3 }
  0x1a   : > { %275 = vadd.xlane.f32.xlu1 %v274_v18  ;;  %272 = vadd.xlane.f32.xlu0 %v271_v19  ;;  %v361_v61 = vsel %vm258_vm0, %v341_v57, 0.0  ;;  %v370_v5 = vsel %vm258_vm0, %v344_v62, 0.0  ;;  %v367_v7 = vsel %vm258_vm0, %v343_v63, 0.0  ;;  %v345_v11 = vmul.f32 %v872_v4, %v872_v4 }
  0x1b   : > { %v376_v14 = vsel %vm258_vm0, %v346_v10, 0.0  ;;  %v348_v18 = vmul.f32 %v881_v12, %v881_v12  ;;  %v347_v19 = vmul.f32 %v884_v13, %v884_v13  ;;  %v350_v26 = vmul.f32 %v893_v20, %v893_v20 }
  0x1c   : > { %v373_v15 = vsel %vm258_vm0, %v345_v11, 0.0  ;;  %v349_v27 = vmul.f32 %v896_v21, %v896_v21  ;;  %v354_v44 = vmul.f32 %v917_v38, %v917_v38  ;;  %v353_v45 = vmul.f32 %v920_v39, %v920_v39 }
  0x1d   : > { %v388_v32 = vsel %vm258_vm0, %v350_v26, 0.0 }
  0x1e   : > { %281 = vadd.xlane.f32.xlu1 %v280_v24  ;;  %278 = vadd.xlane.f32.xlu0 %v277_v25  ;;  %v382_v24 = vsel %vm258_vm0, %v348_v18, 0.0  ;;  %v379_v25 = vsel %vm258_vm0, %v347_v19, 0.0  ;;  %v385_v33 = vsel %vm258_vm0, %v349_v27, 0.0 }
  0x22   : > { %287 = vadd.xlane.f32.xlu1 %v286_v30  ;;  %284 = vadd.xlane.f32.xlu0 %v283_v31  ;;  %v905_v30 = vld [vmem:[%s824_s21 + $0x68] sm:$0xff]  ;;  %v908_v31 = vld [vmem:[%s824_s21 + $0x60] sm:$0xff] }
  0x26   : > { %293 = vadd.xlane.f32.xlu1 %v292_v36  ;;  %290 = vadd.xlane.f32.xlu0 %v289_v37  ;;  %v352_v36 = vmul.f32 %v905_v30, %v905_v30  ;;  %v351_v37 = vmul.f32 %v908_v31, %v908_v31 }
  0x2a   : > { %299 = vadd.xlane.f32.xlu1 %v298_v42  ;;  %296 = vadd.xlane.f32.xlu0 %v295_v43  ;;  %v394_v42 = vsel %vm258_vm0, %v352_v36, 0.0  ;;  %v391_v43 = vsel %vm258_vm0, %v351_v37, 0.0 }
  0x2e   : > { %305 = vadd.xlane.f32.xlu1 %v304_v48  ;;  %302 = vadd.xlane.f32.xlu0 %v301_v49  ;;  %v400_v48 = vsel %vm258_vm0, %v354_v44, 0.0  ;;  %v397_v49 = vsel %vm258_vm0, %v353_v45, 0.0 }
  0x32   : > { %359 = vadd.xlane.f32.xlu1 %v358_v54  ;;  %356 = vadd.xlane.f32.xlu0 %v355_v55 }
  0x36   : > { %365 = vadd.xlane.f32.xlu1 %v364_v60  ;;  %362 = vadd.xlane.f32.xlu0 %v361_v61 }
  0x3a   : > { %371 = vadd.xlane.f32.xlu1 %v370_v5  ;;  %368 = vadd.xlane.f32.xlu0 %v367_v7 }
  0x3e   : > { %377 = vadd.xlane.f32.xlu1 %v376_v14  ;;  %374 = vadd.xlane.f32.xlu0 %v373_v15 }
  0x42   : > { %383 = vadd.xlane.f32.xlu1 %v382_v24  ;;  %380 = vadd.xlane.f32.xlu0 %v379_v25 }
  0x46   : > { %389 = vadd.xlane.f32.xlu1 %v388_v32  ;;  %386 = vadd.xlane.f32.xlu0 %v385_v33 }
  0x4a   : > { %395 = vadd.xlane.f32.xlu1 %v394_v42  ;;  %392 = vadd.xlane.f32.xlu0 %v391_v43 }
  0x4e   : > { %401 = vadd.xlane.f32.xlu1 %v400_v48  ;;  %398 = vadd.xlane.f32.xlu0 %v397_v49 }
  0x9b   : > { %v267_v50 = vpop.xlane.xlu1 %266  ;;  %v261_v51 = vpop.xlane.xlu0 %260 }
  0x9c   : > { %v309_v54 = vmax.f32 %v267_v50, 1e-24  ;;  %v307_v55 = vmax.f32 %v261_v51, 1e-24 }
  0x9e   : > { %624 = vrsqrt.f32 %v309_v54 }
  0x9f   : > { %626 = vrsqrt.f32 %v307_v55  ;;  %v270_v56 = vpop.xlane.xlu1 %269  ;;  %v264_v57 = vpop.xlane.xlu0 %263 }
  0xa0   : > { %v310_v60 = vmax.f32 %v270_v56, 1e-24  ;;  %v308_v61 = vmax.f32 %v264_v57, 1e-24 }
  0xa2   : > { %628 = vrsqrt.f32 %v310_v60 }
  0xa3   : > { %630 = vrsqrt.f32 %v308_v61  ;;  %v276_v62 = vpop.xlane.xlu1 %275  ;;  %v273_v63 = vpop.xlane.xlu0 %272 }
  0xa4   : > { %v312_v5 = vmax.f32 %v276_v62, 1e-24  ;;  %v311_v7 = vmax.f32 %v273_v63, 1e-24 }
  0xa6   : > { %632 = vrsqrt.f32 %v312_v5 }
  0xa7   : > { %634 = vrsqrt.f32 %v311_v7  ;;  %v282_v10 = vpop.xlane.xlu1 %281  ;;  %v279_v11 = vpop.xlane.xlu0 %278 }
  0xa8   : > { %v314_v14 = vmax.f32 %v282_v10, 1e-24  ;;  %v313_v15 = vmax.f32 %v279_v11, 1e-24 }
  0xaa   : > { %636 = vrsqrt.f32 %v314_v14 }
  0xab   : > { %v625_v18 = vpop.eup %624  ;;  %638 = vrsqrt.f32 %v313_v15  ;;  %v288_v19 = vpop.xlane.xlu1 %287 }
  0xac   : > { %v285_v24 = vpop.xlane.xlu0 %284  ;;  %v627_v25 = vpop.eup %626  ;;  %v437_v26 = vmul.f32 %v625_v18, %v733_v0  ;;  %v316_v27 = vmax.f32 %v288_v19, 1e-24 }
  0xad   : > { %v315_v32 = vmax.f32 %v285_v24, 1e-24  ;;  %v435_v33 = vmul.f32 %v627_v25, %v736_v1 }
  0xae   : > { %453 = vst.msk [vmem:[%s934_s24 + $0x10] sm:$0xff] %vm258_vm0, %v437_v26  ;;  %640 = vrsqrt.f32 %v316_v27 }
  0xaf   : > { %v629_v36 = vpop.eup %628  ;;  %451 = vst.msk [vmem:[%s934_s24] sm:$0xff] %vm258_vm0, %v435_v33  ;;  %642 = vrsqrt.f32 %v315_v32  ;;  %v294_v37 = vpop.xlane.xlu1 %293 }
  0xb0   : > { %v291_v42 = vpop.xlane.xlu0 %290  ;;  %v631_v43 = vpop.eup %630  ;;  %v438_v44 = vmul.f32 %v629_v36, %v739_v2  ;;  %v318_v0 = vmax.f32 %v294_v37, 1e-24 }
  0xb1   : > { %v317_v45 = vmax.f32 %v291_v42, 1e-24  ;;  %v436_v48 = vmul.f32 %v631_v43, %v748_v6 }
  0xb2   : > { %454 = vst.msk [vmem:[%s934_s24 + $0x18] sm:$0xff] %vm258_vm0, %v438_v44  ;;  %644 = vrsqrt.f32 %v318_v0 }
  0xb3   : > { %v633_v1 = vpop.eup %632  ;;  %452 = vst.msk [vmem:[%s934_s24 + $0x8] sm:$0xff] %vm258_vm0, %v436_v48  ;;  %646 = vrsqrt.f32 %v317_v45  ;;  %v300_v49 = vpop.xlane.xlu1 %299 }
  0xb4   : > { %v297_v50 = vpop.xlane.xlu0 %296  ;;  %v635_v51 = vpop.eup %634  ;;  %v440_v54 = vmul.f32 %v633_v1, %v753_v8  ;;  %v320_v2 = vmax.f32 %v300_v49, 1e-24 }
  0xb5   : > { %v319_v55 = vmax.f32 %v297_v50, 1e-24  ;;  %v439_v56 = vmul.f32 %v635_v51, %v756_v9 }
  0xb6   : > { %456 = vst.msk [vmem:[%s934_s24 + $0x28] sm:$0xff] %vm258_vm0, %v440_v54  ;;  %648 = vrsqrt.f32 %v320_v2 }
  0xb7   : > { %v637_v6 = vpop.eup %636  ;;  %455 = vst.msk [vmem:[%s934_s24 + $0x20] sm:$0xff] %vm258_vm0, %v439_v56  ;;  %650 = vrsqrt.f32 %v319_v55  ;;  %v306_v57 = vpop.xlane.xlu1 %305 }
  0xb8   : > { %v303_v60 = vpop.xlane.xlu0 %302  ;;  %v639_v61 = vpop.eup %638  ;;  %v442_v62 = vmul.f32 %v637_v6, %v767_v16  ;;  %v322_v8 = vmax.f32 %v306_v57, 1e-24 }
  0xb9   : > { %v321_v63 = vmax.f32 %v303_v60, 1e-24  ;;  %v441_v5 = vmul.f32 %v639_v61, %v770_v17 }
  0xba   : > { %458 = vst.msk [vmem:[%s934_s24 + $0x38] sm:$0xff] %vm258_vm0, %v442_v62  ;;  %652 = vrsqrt.f32 %v322_v8 }
  0xbb   : > { %v641_v9 = vpop.eup %640  ;;  %457 = vst.msk [vmem:[%s934_s24 + $0x30] sm:$0xff] %vm258_vm0, %v441_v5  ;;  %654 = vrsqrt.f32 %v321_v63  ;;  %v360_v7 = vpop.xlane.xlu1 %359 }
  0xbc   : > { %v357_v10 = vpop.xlane.xlu0 %356  ;;  %v643_v11 = vpop.eup %642  ;;  %v444_v14 = vmul.f32 %v641_v9, %v779_v22  ;;  %v404_v16 = vmax.f32 %v360_v7, 1e-24 }
  0xbd   : > { %v403_v15 = vmax.f32 %v357_v10, 1e-24  ;;  %v443_v18 = vmul.f32 %v643_v11, %v782_v23 }
  0xbe   : > { %460 = vst.msk [vmem:[%s934_s24 + $0x48] sm:$0xff] %vm258_vm0, %v444_v14  ;;  %656 = vrsqrt.f32 %v404_v16 }
  0xbf   : > { %v645_v17 = vpop.eup %644  ;;  %459 = vst.msk [vmem:[%s934_s24 + $0x40] sm:$0xff] %vm258_vm0, %v443_v18  ;;  %658 = vrsqrt.f32 %v403_v15  ;;  %v366_v19 = vpop.xlane.xlu1 %365 }
  0xc0   : > { %v363_v24 = vpop.xlane.xlu0 %362  ;;  %v647_v25 = vpop.eup %646  ;;  %v446_v26 = vmul.f32 %v645_v17, %v791_v28  ;;  %v406_v22 = vmax.f32 %v366_v19, 1e-24 }
  0xc1   : > { %v405_v27 = vmax.f32 %v363_v24, 1e-24  ;;  %v445_v32 = vmul.f32 %v647_v25, %v794_v29 }
  0xc2   : > { %462 = vst.msk [vmem:[%s934_s24 + $0x58] sm:$0xff] %vm258_vm0, %v446_v26  ;;  %660 = vrsqrt.f32 %v406_v22 }
  0xc3   : > { %v649_v23 = vpop.eup %648  ;;  %461 = vst.msk [vmem:[%s934_s24 + $0x50] sm:$0xff] %vm258_vm0, %v445_v32  ;;  %662 = vrsqrt.f32 %v405_v27  ;;  %v372_v33 = vpop.xlane.xlu1 %371 }
  0xc4   : > { %v369_v36 = vpop.xlane.xlu0 %368  ;;  %v651_v37 = vpop.eup %650  ;;  %v448_v42 = vmul.f32 %v649_v23, %v803_v34  ;;  %v408_v28 = vmax.f32 %v372_v33, 1e-24 }
  0xc5   : > { %v407_v43 = vmax.f32 %v369_v36, 1e-24  ;;  %v447_v44 = vmul.f32 %v651_v37, %v806_v35 }
  0xc6   : > { %464 = vst.msk [vmem:[%s934_s24 + $0x68] sm:$0xff] %vm258_vm0, %v448_v42  ;;  %664 = vrsqrt.f32 %v408_v28 }
  0xc7   : > { %v653_v29 = vpop.eup %652  ;;  %463 = vst.msk [vmem:[%s934_s24 + $0x60] sm:$0xff] %vm258_vm0, %v447_v44  ;;  %666 = vrsqrt.f32 %v407_v43  ;;  %v378_v0 = vpop.xlane.xlu1 %377 }
  0xc8   : > { %v375_v45 = vpop.xlane.xlu0 %374  ;;  %v655_v48 = vpop.eup %654  ;;  %v450_v1 = vmul.f32 %v653_v29, %v815_v40  ;;  %v410_v34 = vmax.f32 %v378_v0, 1e-24 }
  0xc9   : > { %v409_v49 = vmax.f32 %v375_v45, 1e-24  ;;  %v449_v50 = vmul.f32 %v655_v48, %v818_v41 }
  0xca   : > { %466 = vst.msk [vmem:[%s934_s24 + $0x78] sm:$0xff] %vm258_vm0, %v450_v1  ;;  %668 = vrsqrt.f32 %v410_v34 }
  0xcb   : > { %v657_v35 = vpop.eup %656  ;;  %465 = vst.msk [vmem:[%s934_s24 + $0x70] sm:$0xff] %vm258_vm0, %v449_v50  ;;  %670 = vrsqrt.f32 %v409_v49  ;;  %v384_v51 = vpop.xlane.xlu1 %383 }
  0xcc   : > { %v381_v40 = vpop.xlane.xlu0 %380  ;;  %v659_v54 = vpop.eup %658  ;;  %v468_v2 = vmul.f32 %v657_v35, %v833_v46  ;;  %v412_v41 = vmax.f32 %v384_v51, 1e-24 }
  0xcd   : > { %v411_v55 = vmax.f32 %v381_v40, 1e-24  ;;  %v467_v56 = vmul.f32 %v659_v54, %v836_v47 }
  0xce   : > { %484 = vst.msk [vmem:[%s986_s27 + $0x8] sm:$0xff] %vm258_vm0, %v468_v2  ;;  %672 = vrsqrt.f32 %v412_v41 }
  0xcf   : > { %v661_v6 = vpop.eup %660  ;;  %483 = vst.msk [vmem:[%s986_s27] sm:$0xff] %vm258_vm0, %v467_v56  ;;  %674 = vrsqrt.f32 %v411_v55  ;;  %v390_v57 = vpop.xlane.xlu1 %389 }
  0xd0   : > { %v387_v60 = vpop.xlane.xlu0 %386  ;;  %v663_v61 = vpop.eup %662  ;;  %v470_v62 = vmul.f32 %v661_v6, %v845_v52  ;;  %v414_v46 = vmax.f32 %v390_v57, 1e-24 }
  0xd1   : > { %v413_v8 = vmax.f32 %v387_v60, 1e-24  ;;  %v469_v63 = vmul.f32 %v663_v61, %v848_v53 }
  0xd2   : > { %486 = vst.msk [vmem:[%s986_s27 + $0x18] sm:$0xff] %vm258_vm0, %v470_v62  ;;  %676 = vrsqrt.f32 %v414_v46 }
  0xd3   : > { %v665_v47 = vpop.eup %664  ;;  %485 = vst.msk [vmem:[%s986_s27 + $0x10] sm:$0xff] %vm258_vm0, %v469_v63  ;;  %678 = vrsqrt.f32 %v413_v8  ;;  %v396_v5 = vpop.xlane.xlu1 %395 }
  0xd4   : > { %v393_v9 = vpop.xlane.xlu0 %392  ;;  %v667_v7 = vpop.eup %666  ;;  %v472_v10 = vmul.f32 %v665_v47, %v857_v58  ;;  %v416_v52 = vmax.f32 %v396_v5, 1e-24 }
  0xd5   : > { %v415_v11 = vmax.f32 %v393_v9, 1e-24  ;;  %v471_v14 = vmul.f32 %v667_v7, %v860_v59 }
  0xd6   : > { %488 = vst.msk [vmem:[%s986_s27 + $0x28] sm:$0xff] %vm258_vm0, %v472_v10  ;;  %680 = vrsqrt.f32 %v416_v52 }
  0xd7   : > { %v669_v53 = vpop.eup %668  ;;  %487 = vst.msk [vmem:[%s986_s27 + $0x20] sm:$0xff] %vm258_vm0, %v471_v14  ;;  %682 = vrsqrt.f32 %v415_v11  ;;  %v402_v16 = vpop.xlane.xlu1 %401 }
  0xd8   : > { %v399_v15 = vpop.xlane.xlu0 %398  ;;  %v671_v18 = vpop.eup %670  ;;  %v474_v58 = vmul.f32 %v669_v53, %v869_v3  ;;  %v418_v17 = vmax.f32 %v402_v16, 1e-24 }
  0xd9   : > { %v417_v19 = vmax.f32 %v399_v15, 1e-24  ;;  %v473_v59 = vmul.f32 %v671_v18, %v872_v4 }
  0xda   : > { %490 = vst.msk [vmem:[%s986_s27 + $0x38] sm:$0xff] %vm258_vm0, %v474_v58  ;;  %684 = vrsqrt.f32 %v418_v17 }
  0xdb   : > { %v673_v24 = vpop.eup %672  ;;  %489 = vst.msk [vmem:[%s986_s27 + $0x30] sm:$0xff] %vm258_vm0, %v473_v59  ;;  %686 = vrsqrt.f32 %v417_v19 }
  0xdc   : > { %v675_v25 = vpop.eup %674  ;;  %v476_v26 = vmul.f32 %v673_v24, %v881_v12 }
  0xdd   : > { %v475_v3 = vmul.f32 %v675_v25, %v884_v13 }
  0xde   : > { %492 = vst.msk [vmem:[%s986_s27 + $0x48] sm:$0xff] %vm258_vm0, %v476_v26 }
  0xdf   : > { %v677_v22 = vpop.eup %676  ;;  %491 = vst.msk [vmem:[%s986_s27 + $0x40] sm:$0xff] %vm258_vm0, %v475_v3 }
  0xe0   : > { %v679_v4 = vpop.eup %678  ;;  %v478_v27 = vmul.f32 %v677_v22, %v893_v20 }
  0xe1   : > { %v477_v32 = vmul.f32 %v679_v4, %v896_v21 }
  0xe2   : > { %494 = vst.msk [vmem:[%s986_s27 + $0x58] sm:$0xff] %vm258_vm0, %v478_v27 }
  0xe3   : > { %v681_v23 = vpop.eup %680  ;;  %493 = vst.msk [vmem:[%s986_s27 + $0x50] sm:$0xff] %vm258_vm0, %v477_v32 }
  0xe4   : > { %v683_v12 = vpop.eup %682  ;;  %v480_v13 = vmul.f32 %v681_v23, %v905_v30 }
  0xe5   : > { %v479_v33 = vmul.f32 %v683_v12, %v908_v31 }
  0xe6   : > { %496 = vst.msk [vmem:[%s986_s27 + $0x68] sm:$0xff] %vm258_vm0, %v480_v13 }
  0xe7   : > { %v685_v36 = vpop.eup %684  ;;  %495 = vst.msk [vmem:[%s986_s27 + $0x60] sm:$0xff] %vm258_vm0, %v479_v33 }
  0xe8   : > { %v687_v37 = vpop.eup %686  ;;  %v482_v20 = vmul.f32 %v685_v36, %v917_v38 }
  0xe9   : > { %v481_v21 = vmul.f32 %v687_v37, %v920_v39 }
  0xea   : > { %498 = vst.msk [vmem:[%s986_s27 + $0x78] sm:$0xff] %vm258_vm0, %v482_v20 }
  0xeb   : > { %497 = vst.msk [vmem:[%s986_s27 + $0x70] sm:$0xff] %vm258_vm0, %v481_v21 }
  0xec PF: > { %s14_s12 = sadd.s32 1, %s694_s12  }
  0xed   : > { %p11_p4 = scmp.ge.s32.totalorder %s14_s12, 4  }
  0xef   :  { %13 = sbr.rel (!%p11_p4) target bundleno = 1 (0x1), region = 73 }

// kernel: sup_simsiam_loss.3
= control target key start
LH: loop header
LB: loop body
LE: loop exit
PB: predicated region body
PF: predicated region fallthrough
CT: control target
= control target key end

     0   :  { %s1677_s18 = smov 0   ;;  %s1679_s19 = smov 0   ;;  %s2423_s0 = inlined_call_operand.vmem [shape: s32[256,1], index: 0, kind: input, shape index: {}]   ;;  %s2424_s1 = inlined_call_operand.vmem [shape: s32[1,256], index: 1, kind: input, shape index: {}]   ;;  %s2425_s2 = inlined_call_operand.vmem [shape: f32[256,96], index: 2, kind: input, shape index: {}]   ;;  %s2426_s3 = inlined_call_operand.vmem [shape: f32[256,96], index: 3, kind: input, shape index: {}]   ;;  %s2427_s4 = inlined_call_operand.vmem [shape: f32[256,1], index: 4, kind: output, shape index: {0}]   ;;  %s2428_s5 = inlined_call_operand.vmem [shape: f32[256,1], index: 5, kind: output, shape index: {1}]  }
   0x1   :  { %s1681_s20 = smov 0   ;;  %s1683_s21 = smov 0  }
   0x2   :  { %s1685_s22 = smov 0  }
   0x3 LB: > { %s25_s23 = sadd.s32 1, %s1633_s20  ;;  %s28_s24 = sadd.s32 1, %s1637_s21  ;;  %s1641_s22 = sphi %s1685_s22, %s16_s22   ;;  %s1637_s21 = sphi %s1683_s21, %s2454_s21   ;;  %s1633_s20 = sphi %s1681_s20, %s2453_s20   ;;  %s1629_s19 = sphi %s1679_s19, %s2452_s19   ;;  %s1625_s18 = sphi %s1677_s18, %s2451_s18  }
   0x4   : > { %p26_p0 = scmp.ge.s32.totalorder %s25_s23, 2  ;;  %p1356_p1 = scmp.ge.s32.totalorder %s1641_s22, 1 }
   0x5   : > { %p233_p2 = scmp.lt.s32.totalorder %s1641_s22, 5 }
   0x6   : > { %s2456_s23 = smov (%p26_p0, %s25_s23), 0  ;;  %s2458_s24 = smov (!%p26_p0, %s28_s24), %s1637_s21 }
   0x7   : > { %p234_p3 = pnand %p1356_p1, %p233_p2  ;;  %p30_p4 = scmp.ge.s32.totalorder %s2458_s24, 2 }
   0x8   : > { %s1357_s25 = sshll.u32 (!%p234_p3), %s1629_s19, 4  ;;  %p285_p5 = scmp.lt.s32.totalorder (!%p234_p3), %s1625_s18, 1 }
   0x9   : > { %s2460_s24 = smov (%p30_p4, %s2458_s24), 0  ;;  %237 = sbr.rel (%p234_p3) target bundleno = 733 (0x2dd), region = 36 }
   0xa   : > { %p280_p6 = scmp.lt.s32.totalorder (!%p234_p3), %s1357_s25, 31  ;;  %s1361_s26 = sshll.u32 (!%p234_p3), %s1625_s18, 4 }
   0xb   : > { %p295_p7 = scmp.lt.s32.totalorder (!%p234_p3), %s1361_s26, 31  ;;  %p1367_p8 = scmp.ne.s32.totalorder (!%p234_p3), %s1625_s18, 0 }
   0xe   : > { %s1715_s27 = scalar_select %p285_p5, %s1625_s18, 1 }
   0xf   : > { %s2462_s25 = smov (!%p280_p6, %s1357_s25), 31  ;;  %s2464_s26 = smov (!%p295_p7, %s1361_s26), 31 }
  0x10   : > { %s287_s30 = scalar_lea.vmem %s2424_s1, %s1715_s27  ;;  %s1358_s6 = sshll.u32 %s2462_s25, 3 }
  0x11   : > { %s1724_s9 = scalar_lea.vmem %s2423_s0, %s1358_s6  ;;  %s1729_s12 = scalar_lea.vmem %s2425_s2, %s1358_s6 }
  0x12   : > { %s1734_s15 = scalar_lea.vmem %s2427_s4, %s1358_s6  ;;  %s1739_s25 = scalar_lea.vmem %s2428_s5, %s1358_s6 }
  0x13   : > { %s1362_s28 = sshll.u32 %s2464_s26, 3  ;;  %315 = sbr.rel (%p1367_p8) target bundleno = 41 (0x29), region = 40 }
  0x14   : > { %s1744_s8 = scalar_lea.vmem %s2426_s3, %s1362_s28 }
  0x18   : > { %vm316_vm0 = vcmask 7168   ;;  %v1643_v0 = vmov 0.0  }
  0x19   : > { %317 = vst.msk [vmem:[%s1734_s15] sm:$0xff] %vm316_vm0, %v1643_v0  ;;  %318 = vst.msk [vmem:[%s1734_s15 + $0x8] sm:$0xff] %vm316_vm0, %v1643_v0 }
  0x1a   : > { %319 = vst.msk [vmem:[%s1734_s15 + $0x10] sm:$0xff] %vm316_vm0, %v1643_v0  ;;  %320 = vst.msk [vmem:[%s1734_s15 + $0x18] sm:$0xff] %vm316_vm0, %v1643_v0 }
  0x1b   : > { %321 = vst.msk [vmem:[%s1734_s15 + $0x20] sm:$0xff] %vm316_vm0, %v1643_v0  ;;  %322 = vst.msk [vmem:[%s1734_s15 + $0x28] sm:$0xff] %vm316_vm0, %v1643_v0 }
  0x1c   : > { %323 = vst.msk [vmem:[%s1734_s15 + $0x30] sm:$0xff] %vm316_vm0, %v1643_v0  ;;  %324 = vst.msk [vmem:[%s1734_s15 + $0x38] sm:$0xff] %vm316_vm0, %v1643_v0 }
  0x1d   : > { %325 = vst.msk [vmem:[%s1734_s15 + $0x40] sm:$0xff] %vm316_vm0, %v1643_v0  ;;  %326 = vst.msk [vmem:[%s1734_s15 + $0x48] sm:$0xff] %vm316_vm0, %v1643_v0 }
  0x1e   : > { %327 = vst.msk [vmem:[%s1734_s15 + $0x50] sm:$0xff] %vm316_vm0, %v1643_v0  ;;  %328 = vst.msk [vmem:[%s1734_s15 + $0x58] sm:$0xff] %vm316_vm0, %v1643_v0 }
  0x1f   : > { %329 = vst.msk [vmem:[%s1734_s15 + $0x60] sm:$0xff] %vm316_vm0, %v1643_v0  ;;  %330 = vst.msk [vmem:[%s1734_s15 + $0x68] sm:$0xff] %vm316_vm0, %v1643_v0 }
  0x20   : > { %331 = vst.msk [vmem:[%s1734_s15 + $0x70] sm:$0xff] %vm316_vm0, %v1643_v0  ;;  %332 = vst.msk [vmem:[%s1734_s15 + $0x78] sm:$0xff] %vm316_vm0, %v1643_v0 }
  0x21   : > { %333 = vst.msk [vmem:[%s1739_s25] sm:$0xff] %vm316_vm0, %v1643_v0  ;;  %334 = vst.msk [vmem:[%s1739_s25 + $0x8] sm:$0xff] %vm316_vm0, %v1643_v0 }
  0x22   : > { %335 = vst.msk [vmem:[%s1739_s25 + $0x10] sm:$0xff] %vm316_vm0, %v1643_v0  ;;  %336 = vst.msk [vmem:[%s1739_s25 + $0x18] sm:$0xff] %vm316_vm0, %v1643_v0 }
  0x23   : > { %337 = vst.msk [vmem:[%s1739_s25 + $0x20] sm:$0xff] %vm316_vm0, %v1643_v0  ;;  %338 = vst.msk [vmem:[%s1739_s25 + $0x28] sm:$0xff] %vm316_vm0, %v1643_v0 }
  0x24   : > { %339 = vst.msk [vmem:[%s1739_s25 + $0x30] sm:$0xff] %vm316_vm0, %v1643_v0  ;;  %340 = vst.msk [vmem:[%s1739_s25 + $0x38] sm:$0xff] %vm316_vm0, %v1643_v0 }
  0x25   : > { %341 = vst.msk [vmem:[%s1739_s25 + $0x40] sm:$0xff] %vm316_vm0, %v1643_v0  ;;  %342 = vst.msk [vmem:[%s1739_s25 + $0x48] sm:$0xff] %vm316_vm0, %v1643_v0 }
  0x26   : > { %343 = vst.msk [vmem:[%s1739_s25 + $0x50] sm:$0xff] %vm316_vm0, %v1643_v0  ;;  %344 = vst.msk [vmem:[%s1739_s25 + $0x58] sm:$0xff] %vm316_vm0, %v1643_v0 }
  0x27   : > { %345 = vst.msk [vmem:[%s1739_s25 + $0x60] sm:$0xff] %vm316_vm0, %v1643_v0  ;;  %346 = vst.msk [vmem:[%s1739_s25 + $0x68] sm:$0xff] %vm316_vm0, %v1643_v0 }
  0x28   : > { %347 = vst.msk [vmem:[%s1739_s25 + $0x70] sm:$0xff] %vm316_vm0, %v1643_v0  ;;  %348 = vst.msk [vmem:[%s1739_s25 + $0x78] sm:$0xff] %vm316_vm0, %v1643_v0 }
  0x29 PF: > { %v380_v1 = vld [vmem:[%s1744_s8 + $0x78] sm:$0xff]  ;;  %vm381_vm1 = vcmask 785408   ;;  %v379_v2 = vld [vmem:[%s1744_s8 + $0x70] sm:$0xff]  ;;  %v378_v3 = vld [vmem:[%s1744_s8 + $0x68] sm:$0xff]  ;;  %v1644_v4 = vmov 0   ;;  %p1401_p9 = scmp.ne.s32.totalorder %s1629_s19, %s1625_s18 }
  0x2a   : > { %1469 = vmatprep.subr.msk.mxu0 %vm381_vm1, %v380_v1  ;;  %1525 = vmatprep.subr.msk.mxu1 %vm381_vm1, %v380_v1  ;;  %v349_v5 = vld [vmem:[%s1729_s12] sm:$0xff]  ;;  %v625_v8 = vld [vmem:[%s1724_s9 + $0x10] sm:$0xff]  ;;  %v376_v10 = vld [vmem:[%s1744_s8 + $0x58] sm:$0xff] }
  0x2b   : > { %1470 = vmatpush3.xpose.msk.msra.mxu0 %vm381_vm1, %v380_v1  ;;  %1541 = vmatpush3.xpose.msk.msra.mxu1 %vm381_vm1, %v380_v1  ;;  %v357_v6 = vld [vmem:[%s1729_s12 + $0x40] sm:$0xff]  ;;  %v626_v11 = vld [vmem:[%s1724_s9 + $0x18] sm:$0xff]  ;;  %v624_v12 = vld [vmem:[%s1724_s9 + $0x8] sm:$0xff] }
  0x2c   : > { %1471 = vmatprep.subr.msk.mxu0 %vm381_vm1, %v379_v2  ;;  %1526 = vmatprep.subr.msk.mxu1 %vm381_vm1, %v379_v2  ;;  %v377_v7 = vld [vmem:[%s1744_s8 + $0x60] sm:$0xff]  ;;  %v375_v13 = vld [vmem:[%s1744_s8 + $0x50] sm:$0xff]  ;;  %v628_v14 = vld [vmem:[%s1724_s9 + $0x28] sm:$0xff] }
  0x2d   : > { %1602 = vset.pattern.permute.xlu1 %v1644_v4  ;;  %1601 = vset.pattern.permute.xlu0 %v1644_v4  ;;  %v623_v9 = vld [vmem:[%s1724_s9] sm:$0xff]  ;;  %v374_v16 = vld [vmem:[%s1744_s8 + $0x48] sm:$0xff]  ;;  %v630_v17 = vld [vmem:[%s1724_s9 + $0x38] sm:$0xff] }
  0x2e   : > { %1501 = vmatprep.mubr.msk.f32.mxu0 %vm381_vm1, %v349_v5  ;;  %1513 = vmatprep.mubr.msk.f32.mxu1 %vm381_vm1, %v357_v6  ;;  %v627_v15 = vld [vmem:[%s1724_s9 + $0x20] sm:$0xff]  ;;  %v629_v18 = vld [vmem:[%s1724_s9 + $0x30] sm:$0xff]  ;;  %v632_v20 = vld [vmem:[%s1724_s9 + $0x48] sm:$0xff] }
  0x2f   : > { %1472 = vmatpush3.xpose.msk.msra.mxu0 %vm381_vm1, %v379_v2  ;;  %1542 = vmatpush3.xpose.msk.msra.mxu1 %vm381_vm1, %v379_v2  ;;  %v373_v19 = vld [vmem:[%s1744_s8 + $0x40] sm:$0xff]  ;;  %v372_v22 = vld [vmem:[%s1744_s8 + $0x38] sm:$0xff]  ;;  %v633_v24 = vld [vmem:[%s1724_s9 + $0x50] sm:$0xff] }
  0x30   : > { %1473 = vmatprep.subr.msk.mxu0 %vm381_vm1, %v378_v3  ;;  %1527 = vmatprep.subr.msk.mxu1 %vm381_vm1, %v378_v3  ;;  %v631_v21 = vld [vmem:[%s1724_s9 + $0x40] sm:$0xff]  ;;  %v634_v23 = vld [vmem:[%s1724_s9 + $0x58] sm:$0xff]  ;;  %v371_v25 = vld [vmem:[%s1744_s8 + $0x30] sm:$0xff] }
  0x31   : > { %647 = vperm.xlu1 %1602, %v625_v8   ;;  %641 = vperm.xlu0 %1601, %v623_v9   ;;  %v636_v26 = vld [vmem:[%s1724_s9 + $0x68] sm:$0xff]  ;;  %v635_v27 = vld [vmem:[%s1724_s9 + $0x60] sm:$0xff]  ;;  %v638_v29 = vld [vmem:[%s1724_s9 + $0x78] sm:$0xff] }
  0x32   : > { %v370_v28 = vld [vmem:[%s1744_s8 + $0x28] sm:$0xff]  ;;  %v637_v30 = vld [vmem:[%s1724_s9 + $0x70] sm:$0xff]  ;;  %v369_v31 = vld [vmem:[%s1744_s8 + $0x20] sm:$0xff] }
  0x33   : > { %1474 = vmatpush3.xpose.msk.msra.mxu0 %vm381_vm1, %v378_v3  ;;  %1543 = vmatpush3.xpose.msk.msra.mxu1 %vm381_vm1, %v378_v3  ;;  %v368_v32 = vld [vmem:[%s1744_s8 + $0x18] sm:$0xff]  ;;  %v367_v33 = vld [vmem:[%s1744_s8 + $0x10] sm:$0xff]  ;;  %v366_v34 = vld [vmem:[%s1744_s8 + $0x8] sm:$0xff] }
  0x34   : > { %1475 = vmatprep.subr.msk.mxu0 %vm381_vm1, %v377_v7  ;;  %1528 = vmatprep.subr.msk.mxu1 %vm381_vm1, %v377_v7  ;;  %v365_v35 = vld [vmem:[%s1744_s8] sm:$0xff]  ;;  %v350_v36 = vld [vmem:[%s1729_s12 + $0x8] sm:$0xff]  ;;  %v351_v38 = vld [vmem:[%s1729_s12 + $0x10] sm:$0xff] }
  0x35   : > { %650 = vperm.xlu1 %1602, %v626_v11   ;;  %644 = vperm.xlu0 %1601, %v624_v12   ;;  %v358_v37 = vld [vmem:[%s1729_s12 + $0x48] sm:$0xff]  ;;  %v359_v39 = vld [vmem:[%s1729_s12 + $0x50] sm:$0xff]  ;;  %v352_v40 = vld [vmem:[%s1729_s12 + $0x18] sm:$0xff] }
  0x36   : > { %v360_v41 = vld [vmem:[%s1729_s12 + $0x58] sm:$0xff]  ;;  %v353_v42 = vld [vmem:[%s1729_s12 + $0x20] sm:$0xff]  ;;  %v354_v44 = vld [vmem:[%s1729_s12 + $0x28] sm:$0xff] }
  0x37   : > { %1476 = vmatpush3.xpose.msk.msra.mxu0 %vm381_vm1, %v377_v7  ;;  %1544 = vmatpush3.xpose.msk.msra.mxu1 %vm381_vm1, %v377_v7  ;;  %v361_v43 = vld [vmem:[%s1729_s12 + $0x60] sm:$0xff]  ;;  %v362_v45 = vld [vmem:[%s1729_s12 + $0x68] sm:$0xff]  ;;  %v355_v46 = vld [vmem:[%s1729_s12 + $0x30] sm:$0xff] }
  0x38   : > { %1477 = vmatprep.subr.msk.mxu0 %vm381_vm1, %v376_v10  ;;  %1529 = vmatprep.subr.msk.mxu1 %vm381_vm1, %v376_v10  ;;  %v363_v47 = vld [vmem:[%s1729_s12 + $0x70] sm:$0xff]  ;;  %v356_v48 = vld [vmem:[%s1729_s12 + $0x38] sm:$0xff]  ;;  %v1944_v50 = vld [vmem:[%s287_s30] ss:$0 sm:$0xff] }
  0x39   : > { %656 = vperm.xlu1 %1602, %v628_v14   ;;  %653 = vperm.xlu0 %1601, %v627_v15   ;;  %v364_v49 = vld [vmem:[%s1729_s12 + $0x78] sm:$0xff] }
  0x3b   : > { %1478 = vmatpush3.xpose.msk.msra.mxu0 %vm381_vm1, %v376_v10  ;;  %1545 = vmatpush3.xpose.msk.msra.mxu1 %vm381_vm1, %v376_v10 }
  0x3c   : > { %1479 = vmatprep.subr.msk.mxu0 %vm381_vm1, %v375_v13  ;;  %1530 = vmatprep.subr.msk.mxu1 %vm381_vm1, %v375_v13 }
  0x3d   : > { %662 = vperm.xlu1 %1602, %v630_v17   ;;  %659 = vperm.xlu0 %1601, %v629_v18  }
  0x3f   : > { %1480 = vmatpush3.xpose.msk.msra.mxu0 %vm381_vm1, %v375_v13  ;;  %1546 = vmatpush3.xpose.msk.msra.mxu1 %vm381_vm1, %v375_v13 }
  0x40   : > { %1481 = vmatprep.subr.msk.mxu0 %vm381_vm1, %v374_v16  ;;  %1531 = vmatprep.subr.msk.mxu1 %vm381_vm1, %v374_v16 }
  0x41   : > { %668 = vperm.xlu1 %1602, %v632_v20   ;;  %665 = vperm.xlu0 %1601, %v631_v21  }
  0x43   : > { %1482 = vmatpush3.xpose.msk.msra.mxu0 %vm381_vm1, %v374_v16  ;;  %1547 = vmatpush3.xpose.msk.msra.mxu1 %vm381_vm1, %v374_v16 }
  0x44   : > { %1483 = vmatprep.subr.msk.mxu0 %vm381_vm1, %v373_v19  ;;  %1532 = vmatprep.subr.msk.mxu1 %vm381_vm1, %v373_v19 }
  0x45   : > { %674 = vperm.xlu1 %1602, %v634_v23   ;;  %671 = vperm.xlu0 %1601, %v633_v24  }
  0x47   : > { %1484 = vmatpush3.xpose.msk.msra.mxu0 %vm381_vm1, %v373_v19  ;;  %1548 = vmatpush3.xpose.msk.msra.mxu1 %vm381_vm1, %v373_v19 }
  0x48   : > { %1485 = vmatprep.subr.msk.mxu0 %vm381_vm1, %v372_v22  ;;  %1533 = vmatprep.subr.msk.mxu1 %vm381_vm1, %v372_v22 }
  0x49   : > { %680 = vperm.xlu1 %1602, %v636_v26   ;;  %677 = vperm.xlu0 %1601, %v635_v27  }
  0x4b   : > { %1486 = vmatpush3.xpose.msk.msra.mxu0 %vm381_vm1, %v372_v22  ;;  %1549 = vmatpush3.xpose.msk.msra.mxu1 %vm381_vm1, %v372_v22 }
  0x4c   : > { %1487 = vmatprep.subr.msk.mxu0 %vm381_vm1, %v371_v25  ;;  %1534 = vmatprep.subr.msk.mxu1 %vm381_vm1, %v371_v25 }
  0x4d   : > { %686 = vperm.xlu1 %1602, %v638_v29   ;;  %683 = vperm.xlu0 %1601, %v637_v30  }
  0x4f   : > { %1488 = vmatpush3.xpose.msk.msra.mxu0 %vm381_vm1, %v371_v25  ;;  %1550 = vmatpush3.xpose.msk.msra.mxu1 %vm381_vm1, %v371_v25 }
  0x50   : > { %1489 = vmatprep.subr.msk.mxu0 %vm381_vm1, %v370_v28  ;;  %1535 = vmatprep.subr.msk.mxu1 %vm381_vm1, %v370_v28 }
  0x53   : > { %1490 = vmatpush3.xpose.msk.msra.mxu0 %vm381_vm1, %v370_v28  ;;  %1551 = vmatpush3.xpose.msk.msra.mxu1 %vm381_vm1, %v370_v28 }
  0x54   : > { %1491 = vmatprep.subr.msk.mxu0 %vm381_vm1, %v369_v31  ;;  %1536 = vmatprep.subr.msk.mxu1 %vm381_vm1, %v369_v31 }
  0x57   : > { %1492 = vmatpush3.xpose.msk.msra.mxu0 %vm381_vm1, %v369_v31  ;;  %1552 = vmatpush3.xpose.msk.msra.mxu1 %vm381_vm1, %v369_v31 }
  0x58   : > { %1493 = vmatprep.subr.msk.mxu0 %vm381_vm1, %v368_v32  ;;  %1537 = vmatprep.subr.msk.mxu1 %vm381_vm1, %v368_v32 }
  0x5b   : > { %1494 = vmatpush3.xpose.msk.msra.mxu0 %vm381_vm1, %v368_v32  ;;  %1553 = vmatpush3.xpose.msk.msra.mxu1 %vm381_vm1, %v368_v32 }
  0x5c   : > { %1495 = vmatprep.subr.msk.mxu0 %vm381_vm1, %v367_v33  ;;  %1538 = vmatprep.subr.msk.mxu1 %vm381_vm1, %v367_v33 }
  0x5f   : > { %1496 = vmatpush3.xpose.msk.msra.mxu0 %vm381_vm1, %v367_v33  ;;  %1554 = vmatpush3.xpose.msk.msra.mxu1 %vm381_vm1, %v367_v33 }
  0x60   : > { %1497 = vmatprep.subr.msk.mxu0 %vm381_vm1, %v366_v34  ;;  %1539 = vmatprep.subr.msk.mxu1 %vm381_vm1, %v366_v34 }
  0x63   : > { %1498 = vmatpush3.xpose.msk.msra.mxu0 %vm381_vm1, %v366_v34  ;;  %1555 = vmatpush3.xpose.msk.msra.mxu1 %vm381_vm1, %v366_v34 }
  0x64   : > { %1499 = vmatprep.subr.msk.mxu0 %vm381_vm1, %v365_v35  ;;  %1540 = vmatprep.subr.msk.mxu1 %vm381_vm1, %v365_v35 }
  0x67   : > { %1500 = vmatpush3.xpose.msk.msra.mxu0 %vm381_vm1, %v365_v35  ;;  %1556 = vmatpush3.xpose.msk.msra.mxu1 %vm381_vm1, %v365_v35 }
  0x6a   : > { %1502 = vmatmul.mubr.msk.f32.vlgmr.msra.gmra.mxu0 %vm381_vm1, %v350_v36  ;;  %1514 = vmatmul.mubr.msk.f32.vlgmr.msra.gmra.mxu1 %vm381_vm1, %v358_v37 }
  0x6b   : > { %1504 = vmatprep.mubr.msk.f32.mxu0 %vm381_vm1, %v351_v38  ;;  %1516 = vmatprep.mubr.msk.f32.mxu1 %vm381_vm1, %v359_v39 }
  0x6e   : > { %1505 = vmatmul.mubr.msk.f32.gmra.mxu0 %vm381_vm1, %v352_v40  ;;  %1517 = vmatmul.mubr.msk.f32.gmra.mxu1 %vm381_vm1, %v360_v41 }
  0x6f   : > { %1507 = vmatprep.mubr.msk.f32.mxu0 %vm381_vm1, %v353_v42  ;;  %1519 = vmatprep.mubr.msk.f32.mxu1 %vm381_vm1, %v361_v43 }
  0x72   : > { %1508 = vmatmul.mubr.msk.f32.gmra.mxu0 %vm381_vm1, %v354_v44  ;;  %1520 = vmatmul.mubr.msk.f32.gmra.mxu1 %vm381_vm1, %v362_v45 }
  0x73   : > { %1510 = vmatprep.mubr.msk.f32.mxu0 %vm381_vm1, %v355_v46  ;;  %1522 = vmatprep.mubr.msk.f32.mxu1 %vm381_vm1, %v363_v47 }
  0x76   : > { %1511 = vmatmul.mubr.msk.f32.gmra.mxu0 %vm381_vm1, %v356_v48  ;;  %1523 = vmatmul.mubr.msk.f32.gmra.mxu1 %vm381_vm1, %v364_v49 }
  0xac   : > { %v1946_v51 = vpop.permute.xlu1 %647  ;;  %v1948_v52 = vpop.permute.xlu0 %641 }
  0xad   : > { %vm694_vm2 = vcmp.eq.s32.totalorder %v1946_v51, %v1944_v50  ;;  %vm2429_vm3 = vcmp.eq.s32.totalorder %v1948_v52, %v1944_v50 }
  0xb0   : > { %v1954_v53 = vpop.permute.xlu1 %650  ;;  %v1956_v54 = vpop.permute.xlu0 %644 }
  0xb1   : > { %vm695_vm4 = vcmp.eq.s32.totalorder %v1954_v53, %v1944_v50  ;;  %vm693_vm5 = vcmp.eq.s32.totalorder %v1956_v54, %v1944_v50 }
  0xb4   : > { %v1962_v55 = vpop.permute.xlu1 %656  ;;  %v1964_v56 = vpop.permute.xlu0 %653 }
  0xb5   : > { %vm697_vm6 = vcmp.eq.s32.totalorder %v1962_v55, %v1944_v50  ;;  %vm696_vm7 = vcmp.eq.s32.totalorder %v1964_v56, %v1944_v50 }
  0xb8   : > { %v1970_v57 = vpop.permute.xlu1 %662  ;;  %v1972_v58 = vpop.permute.xlu0 %659 }
  0xb9   : > { %vm2432_vm8 = vcmp.eq.s32.totalorder %v1970_v57, %v1944_v50  ;;  %vm2430_vm9 = vcmp.eq.s32.totalorder %v1972_v58, %v1944_v50 }
  0xbc   : > { %v1978_v59 = vpop.permute.xlu1 %668  ;;  %v1980_v60 = vpop.permute.xlu0 %665 }
  0xbd   : > { %vm2431_vm11 = vcmp.eq.s32.totalorder %v1980_v60, %v1944_v50 }
  0xc0   : > { %v1986_v61 = vpop.permute.xlu1 %674  ;;  %v1988_v62 = vpop.permute.xlu0 %671 }
  0xc4   : > { %v1994_v63 = vpop.permute.xlu1 %680  ;;  %v1996_v0 = vpop.permute.xlu0 %677 }
  0xc8   : > { %v2002_v1 = vpop.permute.xlu1 %686  ;;  %v2004_v2 = vpop.permute.xlu0 %683 }
 0x12a   : > { %v2010_v3 = vpop.f32.mrf.mxu0  ;;  %v2012_v4 = vpop.f32.mrf.mxu1 }
 0x12c   : > { %v2014_v5 = vpop.f32.mrf.mxu0  ;;  %v2016_v6 = vpop.f32.mrf.mxu1 }
 0x12e   : > { %v2018_v7 = vpop.f32.mrf.mxu0  ;;  %v2020_v8 = vpop.f32.mrf.mxu1 }
 0x130   : > { %v2022_v9 = vpop.f32.mrf.mxu0  ;;  %v2024_v10 = vpop.f32.mrf.mxu1 }
 0x132   : > { %v2026_v11 = vpop.f32.mrf.mxu0  ;;  %v2028_v12 = vpop.f32.mrf.mxu1 }
 0x134   : > { %v2030_v13 = vpop.f32.mrf.mxu0  ;;  %v2032_v14 = vpop.f32.mrf.mxu1  ;;  %711 = sbr.rel (%p1401_p9) target bundleno = 523 (0x20b), region = 44 }
 0x136   : > { %v2034_v15 = vpop.f32.mrf.mxu0  ;;  %v2036_v16 = vpop.f32.mrf.mxu1 }
 0x138   : > { %v2038_v17 = vpop.f32.mrf.mxu0  ;;  %v2040_v18 = vpop.f32.mrf.mxu1 }
 0x139   : > { %v712_v19 = vlaneseq }
 0x13b   : > { %v713_v20 = vshrl.u32 %v712_v19, 7  ;;  %v2044_v21 = vand.u32 127, %v712_v19 }
 0x13d   : > { %vm731_vm0 = vcmp.ne.s32.totalorder %v713_v20, %v2044_v21  ;;  %v715_v22 = vadd.s32 16, %v713_v20  ;;  %v716_v23 = vadd.s32 24, %v713_v20  ;;  %v714_v24 = vadd.s32 8, %v713_v20 }
 0x13e   : > { %vm747_vm1 = vmand %vm2429_vm3, %vm731_vm0  ;;  %v718_v25 = vadd.s32 40, %v713_v20  ;;  %v717_v26 = vadd.s32 32, %v713_v20  ;;  %v719_v27 = vadd.s32 48, %v713_v20  ;;  %v720_v30 = vadd.s32 56, %v713_v20 }
 0x13f   : > { %v2051_v28 = vsel %vm747_vm1, %v2014_v5, 0.0  ;;  %vm733_vm14 = vcmp.ne.s32.totalorder %v715_v22, %v2044_v21  ;;  %vm734_vm15 = vcmp.ne.s32.totalorder %v716_v23, %v2044_v21  ;;  %vm732_vm12 = vcmp.ne.s32.totalorder %v714_v24, %v2044_v21 }
 0x140   : > { %795 = vadd.xlane.f32.xlu0 %v2051_v28  ;;  %vm749_vm13 = vmand %vm694_vm2, %vm733_vm14  ;;  %vm736_vm0 = vcmp.ne.s32.totalorder %v718_v25, %v2044_v21  ;;  %vm735_vm3 = vcmp.ne.s32.totalorder %v717_v26, %v2044_v21  ;;  %vm737_vm14 = vcmp.ne.s32.totalorder %v719_v27, %v2044_v21  ;;  %v721_v33 = vadd.s32 64, %v713_v20 }
 0x141   : > { %v2062_v29 = vsel %vm749_vm13, %v2022_v9, 0.0  ;;  %vm750_vm1 = vmand %vm695_vm4, %vm734_vm15  ;;  %v722_v35 = vadd.s32 72, %v713_v20  ;;  %v723_v37 = vadd.s32 80, %v713_v20  ;;  %v724_v39 = vadd.s32 88, %v713_v20 }
 0x142   : > { %799 = vadd.xlane.f32.xlu1 %v2062_v29  ;;  %vm748_vm10 = vmand %vm693_vm5, %vm732_vm12  ;;  %v2073_v31 = vsel %vm750_vm1, %v2018_v7, 0.0  ;;  %vm738_vm12 = vcmp.ne.s32.totalorder %v720_v30, %v2044_v21  ;;  %v725_v41 = vadd.s32 96, %v713_v20  ;;  %v726_v43 = vadd.s32 104, %v713_v20 }
 0x143   : > { %v2076_v32 = vsel %vm748_vm10, %v2010_v3, 0.0  ;;  %vm752_vm13 = vmand %vm697_vm6, %vm736_vm0  ;;  %vm739_vm0 = vcmp.ne.s32.totalorder %v721_v33, %v2044_v21  ;;  %vm740_vm1 = vcmp.ne.s32.totalorder %v722_v35, %v2044_v21  ;;  %v727_v45 = vadd.s32 112, %v713_v20 }
 0x144   : > { %797 = vadd.xlane.f32.xlu0 %v2076_v32  ;;  %vm751_vm15 = vmand %vm696_vm7, %vm735_vm3  ;;  %v2095_v36 = vsel %vm752_vm13, %v2026_v11, 0.0  ;;  %v728_v47 = vadd.s32 120, %v713_v20 }
 0x145   : > { %v2087_v34 = vsel %vm751_vm15, %v2030_v13, 0.0  ;;  %vm753_vm10 = vmand %vm2430_vm9, %vm737_vm14  ;;  %vm741_vm14 = vcmp.ne.s32.totalorder %v723_v37, %v2044_v21  ;;  %vm2433_vm15 = vcmp.eq.s32.totalorder %v1978_v59, %v1944_v50  ;;  %vm2434_vm9 = vcmp.eq.s32.totalorder %v1988_v62, %v1944_v50 }
 0x146   : > { %801 = vadd.xlane.f32.xlu1 %v2073_v31  ;;  %vm754_vm3 = vmand %vm2432_vm8, %vm738_vm12  ;;  %v769_v38 = vsel %vm753_vm10, %v2038_v17, 0.0  ;;  %vm742_vm10 = vcmp.ne.s32.totalorder %v724_v39, %v2044_v21  ;;  %v779_v39 = vld [vmem:[%s1734_s15] sm:$0xff] }
 0x147   : > { %vm755_vm13 = vmand %vm2431_vm11, %vm739_vm0  ;;  %v770_v40 = vsel %vm754_vm3, %v2034_v15, 0.0  ;;  %vm743_vm3 = vcmp.ne.s32.totalorder %v725_v41, %v2044_v21  ;;  %vm2435_vm11 = vcmp.eq.s32.totalorder %v1986_v61, %v1944_v50  ;;  %v781_v41 = vld [vmem:[%s1734_s15 + $0x10] sm:$0xff] }
 0x148   : > { %803 = vadd.xlane.f32.xlu0 %v2087_v34  ;;  %vm756_vm12 = vmand %vm2433_vm15, %vm740_vm1  ;;  %v771_v42 = vsel %vm755_vm13, %v2016_v6, 0.0  ;;  %vm744_vm13 = vcmp.ne.s32.totalorder %v726_v43, %v2044_v21  ;;  %vm2436_vm15 = vcmp.eq.s32.totalorder %v1996_v0, %v1944_v50 }
 0x149   : > { %vm757_vm0 = vmand %vm2434_vm9, %vm741_vm14  ;;  %v772_v44 = vsel %vm756_vm12, %v2012_v4, 0.0  ;;  %vm745_vm14 = vcmp.ne.s32.totalorder %v727_v45, %v2044_v21  ;;  %vm2437_vm12 = vcmp.eq.s32.totalorder %v1994_v63, %v1944_v50 }
 0x14a   : > { %805 = vadd.xlane.f32.xlu1 %v2095_v36  ;;  %vm758_vm1 = vmand %vm2435_vm11, %vm742_vm10  ;;  %v773_v46 = vsel %vm757_vm0, %v2024_v10, 0.0  ;;  %vm746_vm11 = vcmp.ne.s32.totalorder %v728_v47, %v2044_v21  ;;  %vm2438_vm10 = vcmp.eq.s32.totalorder %v2004_v2, %v1944_v50  ;;  %v1645_v21 = vmov 0.0  }
 0x14b   : > { %vm759_vm9 = vmand %vm2436_vm15, %vm743_vm3  ;;  %v774_v48 = vsel %vm758_vm1, %v2020_v8, 0.0  ;;  %vm2439_vm3 = vcmp.eq.s32.totalorder %v2002_v1, %v1944_v50  ;;  %vm877_vm15 = vcmp.ne.f32.partialorder %v2076_v32, 0.0 }
 0x14c   : > { %807 = vadd.xlane.f32.xlu0 %v769_v38  ;;  %vm760_vm8 = vmand %vm2437_vm12, %vm744_vm13  ;;  %v775_v49 = vsel %vm759_vm9, %v2032_v14, 0.0  ;;  %vm876_vm13 = vcmp.ne.f32.partialorder %v2051_v28, 0.0  ;;  %v1403_v24 = vsel %vm877_vm15, 1.0, %v1645_v21  ;;  %vm879_vm9 = vcmp.ne.f32.partialorder %v2073_v31, 0.0 }
 0x14d   : > { %vm761_vm0 = vmand %vm2438_vm10, %vm745_vm14  ;;  %v776_v19 = vsel %vm760_vm8, %v2028_v12, 0.0  ;;  %v1402_v23 = vsel %vm876_vm13, 1.0, %v1645_v21  ;;  %vm878_vm8 = vcmp.ne.f32.partialorder %v2062_v29, 0.0  ;;  %vm880_vm14 = vcmp.ne.f32.partialorder %v2087_v34, 0.0 }
 0x14e   : > { %809 = vadd.xlane.f32.xlu1 %v770_v40  ;;  %vm762_vm1 = vmand %vm2439_vm3, %vm746_vm11  ;;  %v777_v20 = vsel %vm761_vm0, %v2040_v18, 0.0  ;;  %v1404_v25 = vsel %vm878_vm8, 1.0, %v1645_v21  ;;  %v1405_v26 = vsel %vm879_vm9, 1.0, %v1645_v21  ;;  %vm881_vm12 = vcmp.ne.f32.partialorder %v2095_v36, 0.0 }
 0x14f   : > { %v778_v22 = vsel %vm762_vm1, %v2036_v16, 0.0  ;;  %v1406_v27 = vsel %vm880_vm14, 1.0, %v1645_v21  ;;  %vm882_vm11 = vcmp.ne.f32.partialorder %v769_v38, 0.0  ;;  %v1407_v28 = vsel %vm881_vm12, 1.0, %v1645_v21 }
 0x150   : > { %811 = vadd.xlane.f32.xlu0 %v771_v42  ;;  %vm883_vm10 = vcmp.ne.f32.partialorder %v770_v40, 0.0  ;;  %v1408_v30 = vsel %vm882_vm11, 1.0, %v1645_v21  ;;  %vm884_vm0 = vcmp.ne.f32.partialorder %v771_v42, 0.0  ;;  %vm885_vm3 = vcmp.ne.f32.partialorder %v772_v44, 0.0 }
 0x151   : > { %v1409_v29 = vsel %vm883_vm10, 1.0, %v1645_v21  ;;  %v1410_v31 = vsel %vm884_vm0, 1.0, %v1645_v21  ;;  %vm886_vm1 = vcmp.ne.f32.partialorder %v773_v46, 0.0  ;;  %v1411_v32 = vsel %vm885_vm3, 1.0, %v1645_v21 }
 0x152   : > { %813 = vadd.xlane.f32.xlu1 %v772_v44  ;;  %vm887_vm13 = vcmp.ne.f32.partialorder %v774_v48, 0.0  ;;  %v1412_v33 = vsel %vm886_vm1, 1.0, %v1645_v21  ;;  %vm888_vm15 = vcmp.ne.f32.partialorder %v775_v49, 0.0  ;;  %vm889_vm8 = vcmp.ne.f32.partialorder %v776_v19, 0.0  ;;  %v780_v44 = vld [vmem:[%s1734_s15 + $0x8] sm:$0xff] }
 0x153   : > { %v1413_v34 = vsel %vm887_vm13, 1.0, %v1645_v21  ;;  %v1414_v35 = vsel %vm888_vm15, 1.0, %v1645_v21  ;;  %vm890_vm9 = vcmp.ne.f32.partialorder %v777_v20, 0.0  ;;  %v1415_v36 = vsel %vm889_vm8, 1.0, %v1645_v21 }
 0x154   : > { %815 = vadd.xlane.f32.xlu0 %v773_v46  ;;  %vm891_vm14 = vcmp.ne.f32.partialorder %v778_v22, 0.0  ;;  %v1416_v37 = vsel %vm890_vm9, 1.0, %v1645_v21  ;;  %vm843_vm12 = vcmask 7168   ;;  %v782_v46 = vld [vmem:[%s1734_s15 + $0x18] sm:$0xff] }
 0x155   : > { %v1417_v38 = vsel %vm891_vm14, 1.0, %v1645_v21 }
 0x156   : > { %817 = vadd.xlane.f32.xlu1 %v774_v48 }
 0x158   : > { %819 = vadd.xlane.f32.xlu0 %v775_v49 }
 0x15a   : > { %821 = vadd.xlane.f32.xlu1 %v776_v19  ;;  %v783_v19 = vld [vmem:[%s1734_s15 + $0x20] sm:$0xff] }
 0x15c   : > { %823 = vadd.xlane.f32.xlu0 %v777_v20 }
 0x15e   : > { %825 = vadd.xlane.f32.xlu1 %v778_v22  ;;  %v784_v22 = vld [vmem:[%s1734_s15 + $0x28] sm:$0xff] }
 0x160   : > { %924 = vadd.xlane.f32.xlu0 %v1402_v23 }
 0x162   : > { %926 = vadd.xlane.f32.xlu1 %v1403_v24 }
 0x164   : > { %928 = vadd.xlane.f32.xlu0 %v1404_v25  ;;  %v785_v25 = vld [vmem:[%s1734_s15 + $0x30] sm:$0xff] }
 0x166   : > { %930 = vadd.xlane.f32.xlu1 %v1405_v26 }
 0x168   : > { %932 = vadd.xlane.f32.xlu0 %v1406_v27  ;;  %v786_v27 = vld [vmem:[%s1734_s15 + $0x38] sm:$0xff] }
 0x16a   : > { %934 = vadd.xlane.f32.xlu1 %v1407_v28 }
 0x16c   : > { %936 = vadd.xlane.f32.xlu0 %v1408_v30 }
 0x16e   : > { %938 = vadd.xlane.f32.xlu1 %v1409_v29 }
 0x170   : > { %940 = vadd.xlane.f32.xlu0 %v1410_v31  ;;  %v787_v31 = vld [vmem:[%s1734_s15 + $0x40] sm:$0xff] }
 0x172   : > { %942 = vadd.xlane.f32.xlu1 %v1411_v32 }
 0x174   : > { %944 = vadd.xlane.f32.xlu0 %v1412_v33  ;;  %v788_v33 = vld [vmem:[%s1734_s15 + $0x48] sm:$0xff] }
 0x176   : > { %946 = vadd.xlane.f32.xlu1 %v1413_v34 }
 0x178   : > { %948 = vadd.xlane.f32.xlu0 %v1414_v35 }
 0x17a   : > { %950 = vadd.xlane.f32.xlu1 %v1415_v36 }
 0x17c   : > { %952 = vadd.xlane.f32.xlu0 %v1416_v37  ;;  %v789_v37 = vld [vmem:[%s1734_s15 + $0x50] sm:$0xff] }
 0x17e   : > { %954 = vadd.xlane.f32.xlu1 %v1417_v38 }
 0x1c9   : > { %v796_v40 = vpop.xlane.xlu0 %795 }
 0x1ca   : > { %v827_v42 = vadd.f32 %v796_v40, %v779_v39  ;;  %v790_v39 = vld [vmem:[%s1734_s15 + $0x58] sm:$0xff] }
 0x1cb   : > { %v800_v43 = vpop.xlane.xlu1 %799 }
 0x1cc   : > { %844 = vst.msk [vmem:[%s1734_s15] sm:$0xff] %vm843_vm12, %v827_v42  ;;  %v829_v45 = vadd.f32 %v800_v43, %v781_v41  ;;  %v791_v43 = vld [vmem:[%s1734_s15 + $0x60] sm:$0xff] }
 0x1cd   : > { %v798_v47 = vpop.xlane.xlu0 %797 }
 0x1ce   : > { %846 = vst.msk [vmem:[%s1734_s15 + $0x10] sm:$0xff] %vm843_vm12, %v829_v45  ;;  %v828_v48 = vadd.f32 %v798_v47, %v780_v44  ;;  %v792_v45 = vld [vmem:[%s1734_s15 + $0x68] sm:$0xff] }
 0x1cf   : > { %v802_v49 = vpop.xlane.xlu1 %801 }
 0x1d0   : > { %v830_v20 = vadd.f32 %v802_v49, %v782_v46  ;;  %845 = vst.msk [vmem:[%s1734_s15 + $0x8] sm:$0xff] %vm843_vm12, %v828_v48  ;;  %v793_v49 = vld [vmem:[%s1734_s15 + $0x70] sm:$0xff] }
 0x1d1   : > { %v804_v21 = vpop.xlane.xlu0 %803 }
 0x1d2   : > { %847 = vst.msk [vmem:[%s1734_s15 + $0x18] sm:$0xff] %vm843_vm12, %v830_v20  ;;  %v831_v23 = vadd.f32 %v804_v21, %v783_v19  ;;  %v794_v20 = vld [vmem:[%s1734_s15 + $0x78] sm:$0xff] }
 0x1d3   : > { %v806_v24 = vpop.xlane.xlu1 %805 }
 0x1d4   : > { %v832_v26 = vadd.f32 %v806_v24, %v784_v22  ;;  %848 = vst.msk [vmem:[%s1734_s15 + $0x20] sm:$0xff] %vm843_vm12, %v831_v23  ;;  %v860_v24 = vld [vmem:[%s1739_s25] sm:$0xff] }
 0x1d5   : > { %v808_v28 = vpop.xlane.xlu0 %807 }
 0x1d6   : > { %849 = vst.msk [vmem:[%s1734_s15 + $0x28] sm:$0xff] %vm843_vm12, %v832_v26  ;;  %v833_v30 = vadd.f32 %v808_v28, %v785_v25 }
 0x1d7   : > { %v810_v29 = vpop.xlane.xlu1 %809 }
 0x1d8   : > { %v834_v32 = vadd.f32 %v810_v29, %v786_v27  ;;  %850 = vst.msk [vmem:[%s1734_s15 + $0x30] sm:$0xff] %vm843_vm12, %v833_v30  ;;  %v861_v27 = vld [vmem:[%s1739_s25 + $0x8] sm:$0xff]  ;;  %v862_v29 = vld [vmem:[%s1739_s25 + $0x10] sm:$0xff] }
 0x1d9   : > { %v812_v34 = vpop.xlane.xlu0 %811 }
 0x1da   : > { %851 = vst.msk [vmem:[%s1734_s15 + $0x38] sm:$0xff] %vm843_vm12, %v834_v32  ;;  %v835_v35 = vadd.f32 %v812_v34, %v787_v31 }
 0x1db   : > { %v814_v36 = vpop.xlane.xlu1 %813 }
 0x1dc   : > { %v836_v38 = vadd.f32 %v814_v36, %v788_v33  ;;  %852 = vst.msk [vmem:[%s1734_s15 + $0x40] sm:$0xff] %vm843_vm12, %v835_v35  ;;  %v863_v33 = vld [vmem:[%s1739_s25 + $0x18] sm:$0xff]  ;;  %v864_v36 = vld [vmem:[%s1739_s25 + $0x20] sm:$0xff] }
 0x1dd   : > { %v816_v40 = vpop.xlane.xlu0 %815 }
 0x1de   : > { %853 = vst.msk [vmem:[%s1734_s15 + $0x48] sm:$0xff] %vm843_vm12, %v836_v38  ;;  %v837_v41 = vadd.f32 %v816_v40, %v789_v37 }
 0x1df   : > { %v818_v42 = vpop.xlane.xlu1 %817 }
 0x1e0   : > { %v838_v44 = vadd.f32 %v818_v42, %v790_v39  ;;  %854 = vst.msk [vmem:[%s1734_s15 + $0x50] sm:$0xff] %vm843_vm12, %v837_v41  ;;  %v865_v39 = vld [vmem:[%s1739_s25 + $0x28] sm:$0xff]  ;;  %v866_v42 = vld [vmem:[%s1739_s25 + $0x30] sm:$0xff] }
 0x1e1   : > { %v820_v46 = vpop.xlane.xlu0 %819 }
 0x1e2   : > { %855 = vst.msk [vmem:[%s1734_s15 + $0x58] sm:$0xff] %vm843_vm12, %v838_v44  ;;  %v839_v47 = vadd.f32 %v820_v46, %v791_v43 }
 0x1e3   : > { %v822_v48 = vpop.xlane.xlu1 %821 }
 0x1e4   : > { %v840_v19 = vadd.f32 %v822_v48, %v792_v45  ;;  %856 = vst.msk [vmem:[%s1734_s15 + $0x60] sm:$0xff] %vm843_vm12, %v839_v47  ;;  %v867_v45 = vld [vmem:[%s1739_s25 + $0x38] sm:$0xff]  ;;  %v868_v48 = vld [vmem:[%s1739_s25 + $0x40] sm:$0xff] }
 0x1e5   : > { %v824_v22 = vpop.xlane.xlu0 %823 }
 0x1e6   : > { %857 = vst.msk [vmem:[%s1734_s15 + $0x68] sm:$0xff] %vm843_vm12, %v840_v19  ;;  %v841_v21 = vadd.f32 %v824_v22, %v793_v49 }
 0x1e7   : > { %v826_v23 = vpop.xlane.xlu1 %825 }
 0x1e8   : > { %v842_v25 = vadd.f32 %v826_v23, %v794_v20  ;;  %858 = vst.msk [vmem:[%s1734_s15 + $0x70] sm:$0xff] %vm843_vm12, %v841_v21  ;;  %v869_v20 = vld [vmem:[%s1739_s25 + $0x48] sm:$0xff]  ;;  %v870_v23 = vld [vmem:[%s1739_s25 + $0x50] sm:$0xff] }
 0x1e9   : > { %v925_v26 = vpop.xlane.xlu0 %924 }
 0x1ea   : > { %859 = vst.msk [vmem:[%s1734_s15 + $0x78] sm:$0xff] %vm843_vm12, %v842_v25  ;;  %v956_v28 = vadd.f32 %v925_v26, %v860_v24  ;;  %v871_v26 = vld [vmem:[%s1739_s25 + $0x58] sm:$0xff] }
 0x1eb   : > { %v927_v30 = vpop.xlane.xlu1 %926 }
 0x1ec   : > { %972 = vst.msk [vmem:[%s1739_s25] sm:$0xff] %vm843_vm12, %v956_v28  ;;  %v957_v31 = vadd.f32 %v927_v30, %v861_v27  ;;  %v872_v30 = vld [vmem:[%s1739_s25 + $0x60] sm:$0xff] }
 0x1ed   : > { %v929_v32 = vpop.xlane.xlu0 %928 }
 0x1ee   : > { %973 = vst.msk [vmem:[%s1739_s25 + $0x8] sm:$0xff] %vm843_vm12, %v957_v31  ;;  %v958_v34 = vadd.f32 %v929_v32, %v862_v29  ;;  %v873_v32 = vld [vmem:[%s1739_s25 + $0x68] sm:$0xff] }
 0x1ef   : > { %v931_v35 = vpop.xlane.xlu1 %930 }
 0x1f0   : > { %974 = vst.msk [vmem:[%s1739_s25 + $0x10] sm:$0xff] %vm843_vm12, %v958_v34  ;;  %v959_v37 = vadd.f32 %v931_v35, %v863_v33  ;;  %v874_v35 = vld [vmem:[%s1739_s25 + $0x70] sm:$0xff] }
 0x1f1   : > { %v933_v38 = vpop.xlane.xlu0 %932 }
 0x1f2   : > { %975 = vst.msk [vmem:[%s1739_s25 + $0x18] sm:$0xff] %vm843_vm12, %v959_v37  ;;  %v960_v40 = vadd.f32 %v933_v38, %v864_v36  ;;  %v875_v38 = vld [vmem:[%s1739_s25 + $0x78] sm:$0xff] }
 0x1f3   : > { %v935_v41 = vpop.xlane.xlu1 %934 }
 0x1f4   : > { %976 = vst.msk [vmem:[%s1739_s25 + $0x20] sm:$0xff] %vm843_vm12, %v960_v40  ;;  %v961_v43 = vadd.f32 %v935_v41, %v865_v39 }
 0x1f5   : > { %v937_v44 = vpop.xlane.xlu0 %936 }
 0x1f6   : > { %977 = vst.msk [vmem:[%s1739_s25 + $0x28] sm:$0xff] %vm843_vm12, %v961_v43  ;;  %v962_v46 = vadd.f32 %v937_v44, %v866_v42 }
 0x1f7   : > { %v939_v47 = vpop.xlane.xlu1 %938 }
 0x1f8   : > { %978 = vst.msk [vmem:[%s1739_s25 + $0x30] sm:$0xff] %vm843_vm12, %v962_v46  ;;  %v963_v49 = vadd.f32 %v939_v47, %v867_v45 }
 0x1f9   : > { %v941_v19 = vpop.xlane.xlu0 %940 }
 0x1fa   : > { %979 = vst.msk [vmem:[%s1739_s25 + $0x38] sm:$0xff] %vm843_vm12, %v963_v49  ;;  %v964_v22 = vadd.f32 %v941_v19, %v868_v48 }
 0x1fb   : > { %v943_v21 = vpop.xlane.xlu1 %942 }
 0x1fc   : > { %980 = vst.msk [vmem:[%s1739_s25 + $0x40] sm:$0xff] %vm843_vm12, %v964_v22  ;;  %v965_v24 = vadd.f32 %v943_v21, %v869_v20 }
 0x1fd   : > { %v945_v25 = vpop.xlane.xlu0 %944 }
 0x1fe   : > { %981 = vst.msk [vmem:[%s1739_s25 + $0x48] sm:$0xff] %vm843_vm12, %v965_v24  ;;  %v966_v27 = vadd.f32 %v945_v25, %v870_v23 }
 0x1ff   : > { %v947_v28 = vpop.xlane.xlu1 %946 }
 0x200   : > { %982 = vst.msk [vmem:[%s1739_s25 + $0x50] sm:$0xff] %vm843_vm12, %v966_v27  ;;  %v967_v29 = vadd.f32 %v947_v28, %v871_v26 }
 0x201   : > { %v949_v31 = vpop.xlane.xlu0 %948 }
 0x202   : > { %983 = vst.msk [vmem:[%s1739_s25 + $0x58] sm:$0xff] %vm843_vm12, %v967_v29  ;;  %v968_v33 = vadd.f32 %v949_v31, %v872_v30 }
 0x203   : > { %v951_v34 = vpop.xlane.xlu1 %950 }
 0x204   : > { %984 = vst.msk [vmem:[%s1739_s25 + $0x60] sm:$0xff] %vm843_vm12, %v968_v33  ;;  %v969_v36 = vadd.f32 %v951_v34, %v873_v32 }
 0x205   : > { %v953_v37 = vpop.xlane.xlu0 %952 }
 0x206   : > { %985 = vst.msk [vmem:[%s1739_s25 + $0x68] sm:$0xff] %vm843_vm12, %v969_v36  ;;  %v970_v39 = vadd.f32 %v953_v37, %v874_v35 }
 0x207   : > { %v955_v40 = vpop.xlane.xlu1 %954 }
 0x208   : > { %986 = vst.msk [vmem:[%s1739_s25 + $0x70] sm:$0xff] %vm843_vm12, %v970_v39  ;;  %v971_v41 = vadd.f32 %v955_v40, %v875_v38 }
 0x20a   : > { %987 = vst.msk [vmem:[%s1739_s25 + $0x78] sm:$0xff] %vm843_vm12, %v971_v41 }
 0x20b PF: > { %p1418_p10 = scmp.eq.s32.totalorder %s1629_s19, %s1625_s18 }
 0x20d   : > { %991 = sbr.rel (%p1418_p10) target bundleno = 733 (0x2dd), region = 48 }
 0x212   : > { %v994_v42 = vsel %vm694_vm2, %v2022_v9, 0.0  ;;  %vm2440_vm11 = vcmp.eq.s32.totalorder %v1948_v52, %v1944_v50  ;;  %v995_v44 = vsel %vm695_vm4, %v2018_v7, 0.0  ;;  %v993_v45 = vsel %vm693_vm5, %v2010_v3, 0.0  ;;  %v1011_v48 = vld [vmem:[%s1734_s15 + $0x18] sm:$0xff]  ;;  %v1009_v49 = vld [vmem:[%s1734_s15 + $0x8] sm:$0xff]  ;;  %v1012_v24 = vld [vmem:[%s1734_s15 + $0x20] sm:$0xff] }
 0x213   : > { %v992_v43 = vsel %vm2440_vm11, %v2014_v5, 0.0  ;;  %1028 = vadd.xlane.f32.xlu1 %v994_v42  ;;  %v997_v51 = vsel %vm697_vm6, %v2026_v11, 0.0  ;;  %v996_v52 = vsel %vm696_vm7, %v2030_v13, 0.0  ;;  %vm2441_vm2 = vcmp.eq.s32.totalorder %v1970_v57, %v1944_v50  ;;  %v1013_v23 = vld [vmem:[%s1734_s15 + $0x28] sm:$0xff]  ;;  %v1015_v30 = vld [vmem:[%s1734_s15 + $0x38] sm:$0xff]  ;;  %v1014_v29 = vld [vmem:[%s1734_s15 + $0x30] sm:$0xff] }
 0x214   : > { %1024 = vadd.xlane.f32.xlu0 %v992_v43  ;;  %v999_v53 = vsel %vm2441_vm2, %v2034_v15, 0.0  ;;  %vm2442_vm4 = vcmp.eq.s32.totalorder %v1972_v58, %v1944_v50  ;;  %vm2443_vm5 = vcmp.eq.s32.totalorder %v1978_v59, %v1944_v50  ;;  %vm2444_vm6 = vcmp.eq.s32.totalorder %v1980_v60, %v1944_v50  ;;  %v1010_v15 = vld [vmem:[%s1734_s15 + $0x10] sm:$0xff]  ;;  %v1017_v35 = vld [vmem:[%s1734_s15 + $0x48] sm:$0xff]  ;;  %v1016_v36 = vld [vmem:[%s1734_s15 + $0x40] sm:$0xff] }
 0x215   : > { %v998_v54 = vsel %vm2442_vm4, %v2038_v17, 0.0  ;;  %v1001_v55 = vsel %vm2443_vm5, %v2012_v4, 0.0  ;;  %v1000_v56 = vsel %vm2444_vm6, %v2016_v6, 0.0  ;;  %vm2445_vm7 = vcmp.eq.s32.totalorder %v1986_v61, %v1944_v50  ;;  %v1019_v41 = vld [vmem:[%s1734_s15 + $0x58] sm:$0xff] }
 0x216   : > { %v1003_v57 = vsel %vm2445_vm7, %v2020_v8, 0.0  ;;  %vm2446_vm10 = vcmp.eq.s32.totalorder %v1988_v62, %v1944_v50  ;;  %vm2447_vm0 = vcmp.eq.s32.totalorder %v1994_v63, %v1944_v50  ;;  %vm2448_vm3 = vcmp.eq.s32.totalorder %v1996_v0, %v1944_v50 }
 0x217   : > { %1030 = vadd.xlane.f32.xlu1 %v995_v44  ;;  %v1002_v58 = vsel %vm2446_vm10, %v2024_v10, 0.0  ;;  %v1005_v59 = vsel %vm2447_vm0, %v2028_v12, 0.0  ;;  %v1004_v60 = vsel %vm2448_vm3, %v2032_v14, 0.0  ;;  %vm2449_vm1 = vcmp.eq.s32.totalorder %v2002_v1, %v1944_v50 }
 0x218   : > { %1026 = vadd.xlane.f32.xlu0 %v993_v45  ;;  %v1007_v61 = vsel %vm2449_vm1, %v2036_v16, 0.0  ;;  %vm2450_vm13 = vcmp.eq.s32.totalorder %v2004_v2, %v1944_v50  ;;  %vm1106_vm15 = vcmp.ne.f32.partialorder %v993_v45, 0.0  ;;  %vm1105_vm8 = vcmp.ne.f32.partialorder %v992_v43, 0.0  ;;  %v1008_v16 = vld [vmem:[%s1734_s15] sm:$0xff] }
 0x219   : > { %v1006_v62 = vsel %vm2450_vm13, %v2040_v18, 0.0  ;;  %v1646_v63 = vmov 0.0   ;;  %vm1108_vm9 = vcmp.ne.f32.partialorder %v995_v44, 0.0  ;;  %vm1107_vm14 = vcmp.ne.f32.partialorder %v994_v42, 0.0  ;;  %v1018_v42 = vld [vmem:[%s1734_s15 + $0x50] sm:$0xff] }
 0x21a   : > { %v1420_v3 = vsel %vm1106_vm15, 1.0, %v1646_v63  ;;  %v1419_v0 = vsel %vm1105_vm8, 1.0, %v1646_v63  ;;  %v1422_v4 = vsel %vm1108_vm9, 1.0, %v1646_v63  ;;  %v1421_v5 = vsel %vm1107_vm14, 1.0, %v1646_v63 }
 0x21b   : > { %1034 = vadd.xlane.f32.xlu1 %v997_v51  ;;  %vm1110_vm12 = vcmp.ne.f32.partialorder %v997_v51, 0.0  ;;  %vm1109_vm11 = vcmp.ne.f32.partialorder %v996_v52, 0.0  ;;  %vm1112_vm2 = vcmp.ne.f32.partialorder %v999_v53, 0.0  ;;  %vm1111_vm4 = vcmp.ne.f32.partialorder %v998_v54, 0.0 }
 0x21c   : > { %1032 = vadd.xlane.f32.xlu0 %v996_v52  ;;  %v1424_v1 = vsel %vm1110_vm12, 1.0, %v1646_v63  ;;  %v1423_v50 = vsel %vm1109_vm11, 1.0, %v1646_v63  ;;  %v1426_v2 = vsel %vm1112_vm2, 1.0, %v1646_v63  ;;  %v1425_v6 = vsel %vm1111_vm4, 1.0, %v1646_v63  ;;  %v1021_v52 = vld [vmem:[%s1734_s15 + $0x68] sm:$0xff] }
 0x21d   : > { %vm1114_vm5 = vcmp.ne.f32.partialorder %v1001_v55, 0.0  ;;  %vm1113_vm6 = vcmp.ne.f32.partialorder %v1000_v56, 0.0  ;;  %vm1116_vm7 = vcmp.ne.f32.partialorder %v1003_v57, 0.0  ;;  %vm1115_vm10 = vcmp.ne.f32.partialorder %v1002_v58, 0.0 }
 0x21e   : > { %v1428_v7 = vsel %vm1114_vm5, 1.0, %v1646_v63  ;;  %v1427_v8 = vsel %vm1113_vm6, 1.0, %v1646_v63  ;;  %v1430_v9 = vsel %vm1116_vm7, 1.0, %v1646_v63  ;;  %v1429_v10 = vsel %vm1115_vm10, 1.0, %v1646_v63 }
 0x21f   : > { %1038 = vadd.xlane.f32.xlu1 %v999_v53  ;;  %vm1118_vm0 = vcmp.ne.f32.partialorder %v1005_v59, 0.0  ;;  %vm1117_vm3 = vcmp.ne.f32.partialorder %v1004_v60, 0.0  ;;  %vm1120_vm1 = vcmp.ne.f32.partialorder %v1007_v61, 0.0  ;;  %vm1119_vm13 = vcmp.ne.f32.partialorder %v1006_v62, 0.0  ;;  %v1020_v53 = vld [vmem:[%s1734_s15 + $0x60] sm:$0xff] }
 0x220   : > { %1036 = vadd.xlane.f32.xlu0 %v998_v54  ;;  %v1432_v11 = vsel %vm1118_vm0, 1.0, %v1646_v63  ;;  %v1431_v12 = vsel %vm1117_vm3, 1.0, %v1646_v63  ;;  %v1434_v13 = vsel %vm1120_vm1, 1.0, %v1646_v63  ;;  %v1433_v14 = vsel %vm1119_vm13, 1.0, %v1646_v63 }
 0x221   : > { %vm1072_vm15 = vcmask 7168  }
 0x223   : > { %1042 = vadd.xlane.f32.xlu1 %v1001_v55 }
 0x224   : > { %1040 = vadd.xlane.f32.xlu0 %v1000_v56 }
 0x227   : > { %1046 = vadd.xlane.f32.xlu1 %v1003_v57 }
 0x228   : > { %1044 = vadd.xlane.f32.xlu0 %v1002_v58  ;;  %v1023_v58 = vld [vmem:[%s1734_s15 + $0x78] sm:$0xff] }
 0x22b   : > { %1050 = vadd.xlane.f32.xlu1 %v1005_v59  ;;  %v1022_v59 = vld [vmem:[%s1734_s15 + $0x70] sm:$0xff] }
 0x22c   : > { %1048 = vadd.xlane.f32.xlu0 %v1004_v60 }
 0x22f   : > { %1054 = vadd.xlane.f32.xlu1 %v1007_v61 }
 0x230   : > { %1052 = vadd.xlane.f32.xlu0 %v1006_v62 }
 0x233   : > { %1155 = vadd.xlane.f32.xlu1 %v1420_v3  ;;  %v1090_v3 = vld [vmem:[%s1739_s25 + $0x8] sm:$0xff] }
 0x234   : > { %1153 = vadd.xlane.f32.xlu0 %v1419_v0  ;;  %v1089_v0 = vld [vmem:[%s1739_s25] sm:$0xff] }
 0x237   : > { %1159 = vadd.xlane.f32.xlu1 %v1422_v4 }
 0x238   : > { %1157 = vadd.xlane.f32.xlu0 %v1421_v5 }
 0x23b   : > { %1163 = vadd.xlane.f32.xlu1 %v1424_v1 }
 0x23c   : > { %1161 = vadd.xlane.f32.xlu0 %v1423_v50 }
 0x23f   : > { %1167 = vadd.xlane.f32.xlu1 %v1426_v2  ;;  %v1092_v2 = vld [vmem:[%s1739_s25 + $0x18] sm:$0xff] }
 0x240   : > { %1165 = vadd.xlane.f32.xlu0 %v1425_v6  ;;  %v1091_v6 = vld [vmem:[%s1739_s25 + $0x10] sm:$0xff] }
 0x243   : > { %1171 = vadd.xlane.f32.xlu1 %v1428_v7 }
 0x244   : > { %1169 = vadd.xlane.f32.xlu0 %v1427_v8 }
 0x247   : > { %1175 = vadd.xlane.f32.xlu1 %v1430_v9 }
 0x248   : > { %1173 = vadd.xlane.f32.xlu0 %v1429_v10 }
 0x24b   : > { %1179 = vadd.xlane.f32.xlu1 %v1432_v11  ;;  %v1094_v11 = vld [vmem:[%s1739_s25 + $0x28] sm:$0xff] }
 0x24c   : > { %1177 = vadd.xlane.f32.xlu0 %v1431_v12  ;;  %v1093_v12 = vld [vmem:[%s1739_s25 + $0x20] sm:$0xff] }
 0x24f   : > { %1183 = vadd.xlane.f32.xlu1 %v1434_v13 }
 0x250   : > { %1181 = vadd.xlane.f32.xlu0 %v1433_v14 }
 0x29c   : > { %v1029_v17 = vpop.xlane.xlu1 %1028 }
 0x29d   : > { %v1025_v18 = vpop.xlane.xlu0 %1024  ;;  %v1058_v46 = vadd.f32 %v1029_v17, %v1010_v15  ;;  %v1096_v17 = vld [vmem:[%s1739_s25 + $0x38] sm:$0xff] }
 0x29e   : > { %v1056_v47 = vadd.f32 %v1025_v18, %v1008_v16  ;;  %v1095_v18 = vld [vmem:[%s1739_s25 + $0x30] sm:$0xff] }
 0x29f   : > { %1075 = vst.msk [vmem:[%s1734_s15 + $0x10] sm:$0xff] %vm1072_vm15, %v1058_v46 }
 0x2a0   : > { %1073 = vst.msk [vmem:[%s1734_s15] sm:$0xff] %vm1072_vm15, %v1056_v47  ;;  %v1031_v19 = vpop.xlane.xlu1 %1030 }
 0x2a1   : > { %v1027_v20 = vpop.xlane.xlu0 %1026  ;;  %v1059_v22 = vadd.f32 %v1031_v19, %v1011_v48  ;;  %v1098_v19 = vld [vmem:[%s1739_s25 + $0x48] sm:$0xff] }
 0x2a2   : > { %v1057_v21 = vadd.f32 %v1027_v20, %v1009_v49  ;;  %v1097_v20 = vld [vmem:[%s1739_s25 + $0x40] sm:$0xff] }
 0x2a3   : > { %1076 = vst.msk [vmem:[%s1734_s15 + $0x18] sm:$0xff] %vm1072_vm15, %v1059_v22 }
 0x2a4   : > { %1074 = vst.msk [vmem:[%s1734_s15 + $0x8] sm:$0xff] %vm1072_vm15, %v1057_v21  ;;  %v1035_v25 = vpop.xlane.xlu1 %1034 }
 0x2a5   : > { %v1033_v26 = vpop.xlane.xlu0 %1032  ;;  %v1061_v27 = vadd.f32 %v1035_v25, %v1013_v23  ;;  %v1100_v25 = vld [vmem:[%s1739_s25 + $0x58] sm:$0xff] }
 0x2a6   : > { %v1060_v28 = vadd.f32 %v1033_v26, %v1012_v24  ;;  %v1099_v26 = vld [vmem:[%s1739_s25 + $0x50] sm:$0xff] }
 0x2a7   : > { %1078 = vst.msk [vmem:[%s1734_s15 + $0x28] sm:$0xff] %vm1072_vm15, %v1061_v27 }
 0x2a8   : > { %1077 = vst.msk [vmem:[%s1734_s15 + $0x20] sm:$0xff] %vm1072_vm15, %v1060_v28  ;;  %v1039_v31 = vpop.xlane.xlu1 %1038 }
 0x2a9   : > { %v1037_v32 = vpop.xlane.xlu0 %1036  ;;  %v1063_v33 = vadd.f32 %v1039_v31, %v1015_v30  ;;  %v1102_v31 = vld [vmem:[%s1739_s25 + $0x68] sm:$0xff] }
 0x2aa   : > { %v1062_v34 = vadd.f32 %v1037_v32, %v1014_v29  ;;  %v1101_v32 = vld [vmem:[%s1739_s25 + $0x60] sm:$0xff] }
 0x2ab   : > { %1080 = vst.msk [vmem:[%s1734_s15 + $0x38] sm:$0xff] %vm1072_vm15, %v1063_v33 }
 0x2ac   : > { %1079 = vst.msk [vmem:[%s1734_s15 + $0x30] sm:$0xff] %vm1072_vm15, %v1062_v34  ;;  %v1043_v37 = vpop.xlane.xlu1 %1042 }
 0x2ad   : > { %v1041_v38 = vpop.xlane.xlu0 %1040  ;;  %v1065_v39 = vadd.f32 %v1043_v37, %v1017_v35  ;;  %v1104_v37 = vld [vmem:[%s1739_s25 + $0x78] sm:$0xff] }
 0x2ae   : > { %v1064_v40 = vadd.f32 %v1041_v38, %v1016_v36  ;;  %v1103_v38 = vld [vmem:[%s1739_s25 + $0x70] sm:$0xff] }
 0x2af   : > { %1082 = vst.msk [vmem:[%s1734_s15 + $0x48] sm:$0xff] %vm1072_vm15, %v1065_v39 }
 0x2b0   : > { %1081 = vst.msk [vmem:[%s1734_s15 + $0x40] sm:$0xff] %vm1072_vm15, %v1064_v40  ;;  %v1047_v43 = vpop.xlane.xlu1 %1046 }
 0x2b1   : > { %v1045_v44 = vpop.xlane.xlu0 %1044  ;;  %v1067_v45 = vadd.f32 %v1047_v43, %v1019_v41 }
 0x2b2   : > { %v1066_v51 = vadd.f32 %v1045_v44, %v1018_v42 }
 0x2b3   : > { %1084 = vst.msk [vmem:[%s1734_s15 + $0x58] sm:$0xff] %vm1072_vm15, %v1067_v45 }
 0x2b4   : > { %1083 = vst.msk [vmem:[%s1734_s15 + $0x50] sm:$0xff] %vm1072_vm15, %v1066_v51  ;;  %v1051_v54 = vpop.xlane.xlu1 %1050 }
 0x2b5   : > { %v1049_v55 = vpop.xlane.xlu0 %1048  ;;  %v1069_v56 = vadd.f32 %v1051_v54, %v1021_v52 }
 0x2b6   : > { %v1068_v57 = vadd.f32 %v1049_v55, %v1020_v53 }
 0x2b7   : > { %1086 = vst.msk [vmem:[%s1734_s15 + $0x68] sm:$0xff] %vm1072_vm15, %v1069_v56 }
 0x2b8   : > { %1085 = vst.msk [vmem:[%s1734_s15 + $0x60] sm:$0xff] %vm1072_vm15, %v1068_v57  ;;  %v1055_v60 = vpop.xlane.xlu1 %1054 }
 0x2b9   : > { %v1053_v61 = vpop.xlane.xlu0 %1052  ;;  %v1071_v62 = vadd.f32 %v1055_v60, %v1023_v58 }
 0x2ba   : > { %v1070_v63 = vadd.f32 %v1053_v61, %v1022_v59 }
 0x2bb   : > { %1088 = vst.msk [vmem:[%s1734_s15 + $0x78] sm:$0xff] %vm1072_vm15, %v1071_v62 }
 0x2bc   : > { %1087 = vst.msk [vmem:[%s1734_s15 + $0x70] sm:$0xff] %vm1072_vm15, %v1070_v63  ;;  %v1156_v4 = vpop.xlane.xlu1 %1155 }
 0x2bd   : > { %v1154_v5 = vpop.xlane.xlu0 %1153  ;;  %v1186_v1 = vadd.f32 %v1156_v4, %v1090_v3 }
 0x2be   : > { %v1185_v50 = vadd.f32 %v1154_v5, %v1089_v0 }
 0x2bf   : > { %1202 = vst.msk [vmem:[%s1739_s25 + $0x8] sm:$0xff] %vm1072_vm15, %v1186_v1 }
 0x2c0   : > { %1201 = vst.msk [vmem:[%s1739_s25] sm:$0xff] %vm1072_vm15, %v1185_v50  ;;  %v1160_v7 = vpop.xlane.xlu1 %1159 }
 0x2c1   : > { %v1158_v8 = vpop.xlane.xlu0 %1157  ;;  %v1188_v9 = vadd.f32 %v1160_v7, %v1092_v2 }
 0x2c2   : > { %v1187_v10 = vadd.f32 %v1158_v8, %v1091_v6 }
 0x2c3   : > { %1204 = vst.msk [vmem:[%s1739_s25 + $0x18] sm:$0xff] %vm1072_vm15, %v1188_v9 }
 0x2c4   : > { %1203 = vst.msk [vmem:[%s1739_s25 + $0x10] sm:$0xff] %vm1072_vm15, %v1187_v10  ;;  %v1164_v13 = vpop.xlane.xlu1 %1163 }
 0x2c5   : > { %v1162_v14 = vpop.xlane.xlu0 %1161  ;;  %v1190_v15 = vadd.f32 %v1164_v13, %v1094_v11 }
 0x2c6   : > { %v1189_v16 = vadd.f32 %v1162_v14, %v1093_v12 }
 0x2c7   : > { %1206 = vst.msk [vmem:[%s1739_s25 + $0x28] sm:$0xff] %vm1072_vm15, %v1190_v15 }
 0x2c8   : > { %1205 = vst.msk [vmem:[%s1739_s25 + $0x20] sm:$0xff] %vm1072_vm15, %v1189_v16  ;;  %v1168_v46 = vpop.xlane.xlu1 %1167 }
 0x2c9   : > { %v1166_v47 = vpop.xlane.xlu0 %1165  ;;  %v1192_v48 = vadd.f32 %v1168_v46, %v1096_v17 }
 0x2ca   : > { %v1191_v49 = vadd.f32 %v1166_v47, %v1095_v18 }
 0x2cb   : > { %1208 = vst.msk [vmem:[%s1739_s25 + $0x38] sm:$0xff] %vm1072_vm15, %v1192_v48 }
 0x2cc   : > { %1207 = vst.msk [vmem:[%s1739_s25 + $0x30] sm:$0xff] %vm1072_vm15, %v1191_v49  ;;  %v1172_v22 = vpop.xlane.xlu1 %1171 }
 0x2cd   : > { %v1170_v21 = vpop.xlane.xlu0 %1169  ;;  %v1194_v23 = vadd.f32 %v1172_v22, %v1098_v19 }
 0x2ce   : > { %v1193_v24 = vadd.f32 %v1170_v21, %v1097_v20 }
 0x2cf   : > { %1210 = vst.msk [vmem:[%s1739_s25 + $0x48] sm:$0xff] %vm1072_vm15, %v1194_v23 }
 0x2d0   : > { %1209 = vst.msk [vmem:[%s1739_s25 + $0x40] sm:$0xff] %vm1072_vm15, %v1193_v24  ;;  %v1176_v27 = vpop.xlane.xlu1 %1175 }
 0x2d1   : > { %v1174_v28 = vpop.xlane.xlu0 %1173  ;;  %v1196_v30 = vadd.f32 %v1176_v27, %v1100_v25 }
 0x2d2   : > { %v1195_v29 = vadd.f32 %v1174_v28, %v1099_v26 }
 0x2d3   : > { %1212 = vst.msk [vmem:[%s1739_s25 + $0x58] sm:$0xff] %vm1072_vm15, %v1196_v30 }
 0x2d4   : > { %1211 = vst.msk [vmem:[%s1739_s25 + $0x50] sm:$0xff] %vm1072_vm15, %v1195_v29  ;;  %v1180_v33 = vpop.xlane.xlu1 %1179 }
 0x2d5   : > { %v1178_v34 = vpop.xlane.xlu0 %1177  ;;  %v1198_v35 = vadd.f32 %v1180_v33, %v1102_v31 }
 0x2d6   : > { %v1197_v36 = vadd.f32 %v1178_v34, %v1101_v32 }
 0x2d7   : > { %1214 = vst.msk [vmem:[%s1739_s25 + $0x68] sm:$0xff] %vm1072_vm15, %v1198_v35 }
 0x2d8   : > { %1213 = vst.msk [vmem:[%s1739_s25 + $0x60] sm:$0xff] %vm1072_vm15, %v1197_v36  ;;  %v1184_v39 = vpop.xlane.xlu1 %1183 }
 0x2d9   : > { %v1182_v40 = vpop.xlane.xlu0 %1181  ;;  %v1200_v41 = vadd.f32 %v1184_v39, %v1104_v37 }
 0x2da   : > { %v1199_v42 = vadd.f32 %v1182_v40, %v1103_v38 }
 0x2db   : > { %1216 = vst.msk [vmem:[%s1739_s25 + $0x78] sm:$0xff] %vm1072_vm15, %v1200_v41 }
 0x2dc   : > { %1215 = vst.msk [vmem:[%s1739_s25 + $0x70] sm:$0xff] %vm1072_vm15, %v1199_v42 }
 0x2dd PF: > { %s16_s22 = sadd.s32 1, %s1641_s22   ;;  %s2451_s18 = smov %s1633_s20 }
 0x2de   : > { %p13_p11 = scmp.ge.s32.totalorder %s16_s22, 6   ;;  %s2452_s19 = smov %s1637_s21 }
 0x2df   : > { %s2453_s20 = smov %s2456_s23  ;;  %s2454_s21 = smov %s2460_s24 }
 0x2e0   :  { %15 = sbr.rel (!%p13_p11) target bundleno = 3 (0x3), region = 99 }

</bundles_post_ra>
